<compile_context>
chip_gen: v7x
topology: tpu7x:2x2x1
jax: 0.10.0
libtpu: 0.0.40
codegen_flags: <defaults>
</compile_context>

<pallas_src>
import functools

import numpy as np
import jax
import jax.numpy as jnp
from jax import lax
from jax.experimental import pallas as pl
from jax.experimental.pallas import tpu as pltpu

# ---- static model dims ------------------------------------------------------
B = 2          # batch
C = 4          # input channels
H = W = 16     # spatial
K = 3          # conv kernel
F = 8          # conv output channels
ENC_DIM = 32   # encoder embedding dim
HID_DIM = 64   # projector hidden dim
PROJ_DIM = 16  # projector output dim

HP = H + 2                 # padded height
WP = W + 2                 # padded width
N_PAD = B * HP * WP        # 648 flattened padded positions (all batches, one view)
LC = 640                   # lane-aligned per-view conv-output width (max valid pos 609)
LTOT = 768                 # per-view padded flat input width (>= LC + max tap offset 38)

_MAX_VALID_P = (B - 1) * HP * WP + (H - 1) * WP + (W - 1)          # 609
_MAX_TAP = (K - 1) * WP + (K - 1)                                  # 38
assert LC % 128 == 0 and LC >= _MAX_VALID_P + 1
assert LTOT % 128 == 0 and LTOT >= max(N_PAD, LC + _MAX_TAP)


# ---- Pallas kernel: whole forward for ALL views in one invocation ------------
def _siamese_kernel(x_ref, wc_ref, bc_ref, sel_ref, we_ref, be_ref,
                    w1_ref, b1_ref, w2_ref, b2_ref, out_ref, *, lc_total):
    # x_ref: (C, V*LTOT) — per-view flattened zero-padded NCHW inputs,
    # lane-concatenated.  lc_total = (V-1)*LTOT + LC.
    #
    # Conv2d(pad=1) as 9 accumulated matmuls in transposed layout:
    #   conv[f, p] = sum_{kh,kw,c} W[f,c,kh,kw] * x_flat[c, p + kh*WP + kw]
    # p indexes flattened padded positions; invalid / cross-view positions are
    # zeroed by the pooling selector.
    acc = jnp.zeros((F, lc_total), jnp.float32)
    for kh in range(K):
        for kw in range(K):
            d = kh * WP + kw
            acc = acc + jnp.dot(wc_ref[kh * K + kw], x_ref[:, d:d + lc_total],
                                preferred_element_type=jnp.float32)
    conv = jnp.maximum(acc + bc_ref[...], 0.0)                # (F, lc_total)

    # Global average pool as an MXU matmul with a constant selector
    # (1/(H*W) at valid (v,b,h,w) positions, 0 elsewhere) -> (F, V*B)
    pooled_t = jnp.dot(conv, sel_ref[...],
                       preferred_element_type=jnp.float32)    # (F, V*B)

    # Encoder linear + ReLU, projector MLP — kept in transposed (feat, batch)
    # layout so every op is a plain matmul (no in-kernel transposes).
    enc_t = jnp.maximum(
        jnp.dot(we_ref[...], pooled_t, preferred_element_type=jnp.float32)
        + be_ref[...], 0.0)                                   # (ENC, V*B)
    h_t = jnp.maximum(
        jnp.dot(w1_ref[...], enc_t, preferred_element_type=jnp.float32)
        + b1_ref[...], 0.0)                                   # (HID, V*B)
    out_ref[...] = (jnp.dot(w2_ref[...], h_t, preferred_element_type=jnp.float32)
                    + b2_ref[...])                            # (PROJ, V*B)


# ---- constant pooling selector (built at trace time, per view count) ---------
def _build_pool_selector(num_views):
    lc_total = (num_views - 1) * LTOT + LC
    sel = np.zeros((lc_total, num_views * B), np.float32)
    inv = 1.0 / (H * W)
    for v in range(num_views):
        for b in range(B):
            for h in range(H):
                base = v * LTOT + b * HP * WP + h * WP
                sel[base:base + W, v * B + b] = inv
    return sel


# ---- glue: flatten padded input (pure layout, ~4 tiny XLA ops per view) ------
def _prep_input(x):
    # (B, C, H, W) -> (C, LTOT) with layout x_flat[c, b*HP*WP + hh*WP + ww]
    xt = jnp.transpose(x.astype(jnp.float32), (1, 0, 2, 3))     # (C, B, H, W)
    xp = jnp.pad(xt, ((0, 0), (0, 0), (1, 1), (1, 1)))          # (C, B, HP, WP)
    xf = xp.reshape(C, N_PAD)                                   # contiguous collapse
    return jnp.pad(xf, ((0, 0), (0, LTOT - N_PAD)))             # (C, LTOT)


@jax.jit
def siamese_forward(params, *args):
    """SiameseModel.forward: shared encoder+projector applied to each input."""
    V = len(args)
    lc_total = (V - 1) * LTOT + LC
    x_all = jnp.concatenate([_prep_input(x) for x in args], axis=1)  # (C, V*LTOT)
    sel = jnp.asarray(_build_pool_selector(V))                       # (lc_total, V*B)

    # Single grid-less invocation: every operand is a whole-array VMEM block
    # (total footprint « 1 MiB), so no BlockSpec tiling / grid machinery needed.
    out_t = pl.pallas_call(
        functools.partial(_siamese_kernel, lc_total=lc_total),
        out_shape=jax.ShapeDtypeStruct((PROJ_DIM, V * B), jnp.float32),
    )(x_all, params["wc"], params["bc"], sel,
      params["we"], params["be"], params["w1"], params["b1"],
      params["w2"], params["b2"])

    out = out_t.T.reshape(V, B, PROJ_DIM)                            # (V, B, PROJ)
    return out[0] if V == 1 else tuple(out[v] for v in range(V))


# ---- deterministic parameter init (synthetic, not a checkpoint) --------------
def init_params(key):
    ks = jax.random.split(key, 8)
    s = 0.1
    # conv weight in PyTorch OIHW layout -> per-tap (K*K, F, C)
    wc_torch = s * jax.random.normal(ks[0], (F, C, K, K), jnp.float32)
    wc = jnp.transpose(wc_torch, (2, 3, 0, 1)).reshape(K * K, F, C)
    return {
        "wc": wc,
        "bc": s * jax.random.normal(ks[1], (F, 1), jnp.float32),
        "we": s * jax.random.normal(ks[2], (ENC_DIM, F), jnp.float32),
        "be": s * jax.random.normal(ks[3], (ENC_DIM, 1), jnp.float32),
        "w1": s * jax.random.normal(ks[4], (HID_DIM, ENC_DIM), jnp.float32),
        "b1": s * jax.random.normal(ks[5], (HID_DIM, 1), jnp.float32),
        "w2": s * jax.random.normal(ks[6], (PROJ_DIM, HID_DIM), jnp.float32),
        "b2": s * jax.random.normal(ks[7], (PROJ_DIM, 1), jnp.float32),
    }


# ---- pure-JAX reference (independent path: real conv, mean pooling) ----------
def _reference_once(x, p):
    w_oihw = jnp.transpose(p["wc"].reshape(K, K, F, C), (2, 3, 0, 1))  # (F,C,K,K)
    conv = lax.conv_general_dilated(
        x.astype(jnp.float32), w_oihw, window_strides=(1, 1),
        padding=((1, 1), (1, 1)),
        dimension_numbers=("NCHW", "OIHW", "NCHW"))
    conv = jnp.maximum(conv + p["bc"].reshape(1, F, 1, 1), 0.0)
    pooled = jnp.mean(conv, axis=(2, 3))                               # (B, F)
    enc = jnp.maximum(pooled @ p["we"].T + p["be"].T, 0.0)
    h = jnp.maximum(enc @ p["w1"].T + p["b1"].T, 0.0)
    return h @ p["w2"].T + p["b2"].T


if __name__ == "__main__":
    key = jax.random.PRNGKey(0)
    kp, kx1, kx2 = jax.random.split(key, 3)
    params = init_params(kp)

    # two siamese views, PyTorch NCHW layout
    x1 = jax.random.normal(kx1, (B, C, H, W), jnp.float32)
    x2 = jax.random.normal(kx2, (B, C, H, W), jnp.float32)

    out1, out2 = siamese_forward(params, x1, x2)
    out1 = jax.block_until_ready(out1)
    out2 = jax.block_until_ready(out2)

    ref1 = _reference_once(x1, params)
    ref2 = _reference_once(x2, params)
    assert out1.shape == (B, PROJ_DIM) and out2.shape == (B, PROJ_DIM)
    np.testing.assert_allclose(np.asarray(out1), np.asarray(ref1), rtol=1e-4, atol=1e-4)
    np.testing.assert_allclose(np.asarray(out2), np.asarray(ref2), rtol=1e-4, atol=1e-4)

    # single-input path (forward returns a single array, not a tuple)
    out_single = jax.block_until_ready(siamese_forward(params, x1))
    np.testing.assert_allclose(np.asarray(out_single), np.asarray(ref1),
                               rtol=1e-4, atol=1e-4)

    print("KERNEL_OK")
</pallas_src>

<mosaic_0001>
module attributes {stable_mosaic.version = 11 : i64} {
  func.func @_siamese_kernel(%arg0: memref<4x1536xf32, #tpu.memory_space<vmem>>, %arg1: memref<9x8x4xf32, #tpu.memory_space<vmem>>, %arg2: memref<8x1xf32, #tpu.memory_space<vmem>>, %arg3: memref<1408x4xf32, #tpu.memory_space<vmem>>, %arg4: memref<32x8xf32, #tpu.memory_space<vmem>>, %arg5: memref<32x1xf32, #tpu.memory_space<vmem>>, %arg6: memref<64x32xf32, #tpu.memory_space<vmem>>, %arg7: memref<64x1xf32, #tpu.memory_space<vmem>>, %arg8: memref<16x64xf32, #tpu.memory_space<vmem>>, %arg9: memref<16x1xf32, #tpu.memory_space<vmem>>, %arg10: memref<16x4xf32, #tpu.memory_space<vmem>>) attributes {dimension_semantics = [], scalar_prefetch = 0 : i64, scratch_operands = 0 : i64, tpu.core_type = #tpu.core_type<tc>} {
    %cst = arith.constant 0.000000e+00 : f32
    %0 = vector.broadcast %cst : f32 to vector<8x1408xf32>
    %c0 = arith.constant 0 : index
    %c0_0 = arith.constant 0 : index
    %c0_1 = arith.constant 0 : index
    %1 = vector.load %arg1[%c0, %c0_0, %c0_1] : memref<9x8x4xf32, #tpu.memory_space<vmem>>, vector<1x8x4xf32>
    %2 = vector.shape_cast %1 : vector<1x8x4xf32> to vector<8x4xf32>
    %c0_2 = arith.constant 0 : index
    %c0_3 = arith.constant 0 : index
    %3 = vector.load %arg0[%c0_2, %c0_3] : memref<4x1536xf32, #tpu.memory_space<vmem>>, vector<4x1408xf32>
    %cst_4 = arith.constant dense<0.000000e+00> : vector<8x1408xf32>
    %4 = tpu.matmul %2, %3, %cst_4 {dimension_numbers = #tpu.dot_dimension_numbers<[1], [0], [0], [1], [0, 0, 1, 1], [], []>} : vector<8x4xf32>, vector<4x1408xf32>, vector<8x1408xf32> -> vector<8x1408xf32>
    %5 = arith.addf %0, %4 : vector<8x1408xf32>
    %c1 = arith.constant 1 : index
    %c0_5 = arith.constant 0 : index
    %c0_6 = arith.constant 0 : index
    %6 = vector.load %arg1[%c1, %c0_5, %c0_6] : memref<9x8x4xf32, #tpu.memory_space<vmem>>, vector<1x8x4xf32>
    %7 = vector.shape_cast %6 : vector<1x8x4xf32> to vector<8x4xf32>
    %c0_7 = arith.constant 0 : index
    %c1_8 = arith.constant 1 : index
    %8 = vector.load %arg0[%c0_7, %c1_8] : memref<4x1536xf32, #tpu.memory_space<vmem>>, vector<4x1408xf32>
    %cst_9 = arith.constant dense<0.000000e+00> : vector<8x1408xf32>
    %9 = tpu.matmul %7, %8, %cst_9 {dimension_numbers = #tpu.dot_dimension_numbers<[1], [0], [0], [1], [0, 0, 1, 1], [], []>} : vector<8x4xf32>, vector<4x1408xf32>, vector<8x1408xf32> -> vector<8x1408xf32>
    %10 = arith.addf %5, %9 : vector<8x1408xf32>
    %c2 = arith.constant 2 : index
    %c0_10 = arith.constant 0 : index
    %c0_11 = arith.constant 0 : index
    %11 = vector.load %arg1[%c2, %c0_10, %c0_11] : memref<9x8x4xf32, #tpu.memory_space<vmem>>, vector<1x8x4xf32>
    %12 = vector.shape_cast %11 : vector<1x8x4xf32> to vector<8x4xf32>
    %c0_12 = arith.constant 0 : index
    %c2_13 = arith.constant 2 : index
    %13 = vector.load %arg0[%c0_12, %c2_13] : memref<4x1536xf32, #tpu.memory_space<vmem>>, vector<4x1408xf32>
    %cst_14 = arith.constant dense<0.000000e+00> : vector<8x1408xf32>
    %14 = tpu.matmul %12, %13, %cst_14 {dimension_numbers = #tpu.dot_dimension_numbers<[1], [0], [0], [1], [0, 0, 1, 1], [], []>} : vector<8x4xf32>, vector<4x1408xf32>, vector<8x1408xf32> -> vector<8x1408xf32>
    %15 = arith.addf %10, %14 : vector<8x1408xf32>
    %c3 = arith.constant 3 : index
    %c0_15 = arith.constant 0 : index
    %c0_16 = arith.constant 0 : index
    %16 = vector.load %arg1[%c3, %c0_15, %c0_16] : memref<9x8x4xf32, #tpu.memory_space<vmem>>, vector<1x8x4xf32>
    %17 = vector.shape_cast %16 : vector<1x8x4xf32> to vector<8x4xf32>
    %c0_17 = arith.constant 0 : index
    %c18 = arith.constant 18 : index
    %18 = vector.load %arg0[%c0_17, %c18] : memref<4x1536xf32, #tpu.memory_space<vmem>>, vector<4x1408xf32>
    %cst_18 = arith.constant dense<0.000000e+00> : vector<8x1408xf32>
    %19 = tpu.matmul %17, %18, %cst_18 {dimension_numbers = #tpu.dot_dimension_numbers<[1], [0], [0], [1], [0, 0, 1, 1], [], []>} : vector<8x4xf32>, vector<4x1408xf32>, vector<8x1408xf32> -> vector<8x1408xf32>
    %20 = arith.addf %15, %19 : vector<8x1408xf32>
    %c4 = arith.constant 4 : index
    %c0_19 = arith.constant 0 : index
    %c0_20 = arith.constant 0 : index
    %21 = vector.load %arg1[%c4, %c0_19, %c0_20] : memref<9x8x4xf32, #tpu.memory_space<vmem>>, vector<1x8x4xf32>
    %22 = vector.shape_cast %21 : vector<1x8x4xf32> to vector<8x4xf32>
    %c0_21 = arith.constant 0 : index
    %c19 = arith.constant 19 : index
    %23 = vector.load %arg0[%c0_21, %c19] : memref<4x1536xf32, #tpu.memory_space<vmem>>, vector<4x1408xf32>
    %cst_22 = arith.constant dense<0.000000e+00> : vector<8x1408xf32>
    %24 = tpu.matmul %22, %23, %cst_22 {dimension_numbers = #tpu.dot_dimension_numbers<[1], [0], [0], [1], [0, 0, 1, 1], [], []>} : vector<8x4xf32>, vector<4x1408xf32>, vector<8x1408xf32> -> vector<8x1408xf32>
    %25 = arith.addf %20, %24 : vector<8x1408xf32>
    %c5 = arith.constant 5 : index
    %c0_23 = arith.constant 0 : index
    %c0_24 = arith.constant 0 : index
    %26 = vector.load %arg1[%c5, %c0_23, %c0_24] : memref<9x8x4xf32, #tpu.memory_space<vmem>>, vector<1x8x4xf32>
    %27 = vector.shape_cast %26 : vector<1x8x4xf32> to vector<8x4xf32>
    %c0_25 = arith.constant 0 : index
    %c20 = arith.constant 20 : index
    %28 = vector.load %arg0[%c0_25, %c20] : memref<4x1536xf32, #tpu.memory_space<vmem>>, vector<4x1408xf32>
    %cst_26 = arith.constant dense<0.000000e+00> : vector<8x1408xf32>
    %29 = tpu.matmul %27, %28, %cst_26 {dimension_numbers = #tpu.dot_dimension_numbers<[1], [0], [0], [1], [0, 0, 1, 1], [], []>} : vector<8x4xf32>, vector<4x1408xf32>, vector<8x1408xf32> -> vector<8x1408xf32>
    %30 = arith.addf %25, %29 : vector<8x1408xf32>
    %c6 = arith.constant 6 : index
    %c0_27 = arith.constant 0 : index
    %c0_28 = arith.constant 0 : index
    %31 = vector.load %arg1[%c6, %c0_27, %c0_28] : memref<9x8x4xf32, #tpu.memory_space<vmem>>, vector<1x8x4xf32>
    %32 = vector.shape_cast %31 : vector<1x8x4xf32> to vector<8x4xf32>
    %c0_29 = arith.constant 0 : index
    %c36 = arith.constant 36 : index
    %33 = vector.load %arg0[%c0_29, %c36] : memref<4x1536xf32, #tpu.memory_space<vmem>>, vector<4x1408xf32>
    %cst_30 = arith.constant dense<0.000000e+00> : vector<8x1408xf32>
    %34 = tpu.matmul %32, %33, %cst_30 {dimension_numbers = #tpu.dot_dimension_numbers<[1], [0], [0], [1], [0, 0, 1, 1], [], []>} : vector<8x4xf32>, vector<4x1408xf32>, vector<8x1408xf32> -> vector<8x1408xf32>
    %35 = arith.addf %30, %34 : vector<8x1408xf32>
    %c7 = arith.constant 7 : index
    %c0_31 = arith.constant 0 : index
    %c0_32 = arith.constant 0 : index
    %36 = vector.load %arg1[%c7, %c0_31, %c0_32] : memref<9x8x4xf32, #tpu.memory_space<vmem>>, vector<1x8x4xf32>
    %37 = vector.shape_cast %36 : vector<1x8x4xf32> to vector<8x4xf32>
    %c0_33 = arith.constant 0 : index
    %c37 = arith.constant 37 : index
    %38 = vector.load %arg0[%c0_33, %c37] : memref<4x1536xf32, #tpu.memory_space<vmem>>, vector<4x1408xf32>
    %cst_34 = arith.constant dense<0.000000e+00> : vector<8x1408xf32>
    %39 = tpu.matmul %37, %38, %cst_34 {dimension_numbers = #tpu.dot_dimension_numbers<[1], [0], [0], [1], [0, 0, 1, 1], [], []>} : vector<8x4xf32>, vector<4x1408xf32>, vector<8x1408xf32> -> vector<8x1408xf32>
    %40 = arith.addf %35, %39 : vector<8x1408xf32>
    %c8 = arith.constant 8 : index
    %c0_35 = arith.constant 0 : index
    %c0_36 = arith.constant 0 : index
    %41 = vector.load %arg1[%c8, %c0_35, %c0_36] : memref<9x8x4xf32, #tpu.memory_space<vmem>>, vector<1x8x4xf32>
    %42 = vector.shape_cast %41 : vector<1x8x4xf32> to vector<8x4xf32>
    %c0_37 = arith.constant 0 : index
    %c38 = arith.constant 38 : index
    %43 = vector.load %arg0[%c0_37, %c38] : memref<4x1536xf32, #tpu.memory_space<vmem>>, vector<4x1408xf32>
    %cst_38 = arith.constant dense<0.000000e+00> : vector<8x1408xf32>
    %44 = tpu.matmul %42, %43, %cst_38 {dimension_numbers = #tpu.dot_dimension_numbers<[1], [0], [0], [1], [0, 0, 1, 1], [], []>} : vector<8x4xf32>, vector<4x1408xf32>, vector<8x1408xf32> -> vector<8x1408xf32>
    %45 = arith.addf %40, %44 : vector<8x1408xf32>
    %c0_39 = arith.constant 0 : index
    %c0_40 = arith.constant 0 : index
    %46 = vector.load %arg2[%c0_39, %c0_40] : memref<8x1xf32, #tpu.memory_space<vmem>>, vector<8x1xf32>
    %47 = vector.broadcast %46 : vector<8x1xf32> to vector<8x1408xf32>
    %48 = arith.addf %45, %47 : vector<8x1408xf32>
    %cst_41 = arith.constant 0.000000e+00 : f32
    %49 = vector.broadcast %cst_41 : f32 to vector<8x1408xf32>
    %50 = arith.maximumf %48, %49 : vector<8x1408xf32>
    %c0_42 = arith.constant 0 : index
    %c0_43 = arith.constant 0 : index
    %51 = vector.load %arg3[%c0_42, %c0_43] : memref<1408x4xf32, #tpu.memory_space<vmem>>, vector<1408x4xf32>
    %cst_44 = arith.constant dense<0.000000e+00> : vector<8x4xf32>
    %52 = tpu.matmul %50, %51, %cst_44 {dimension_numbers = #tpu.dot_dimension_numbers<[1], [0], [0], [1], [0, 0, 1, 1], [], []>} : vector<8x1408xf32>, vector<1408x4xf32>, vector<8x4xf32> -> vector<8x4xf32>
    %c0_45 = arith.constant 0 : index
    %c0_46 = arith.constant 0 : index
    %53 = vector.load %arg4[%c0_45, %c0_46] : memref<32x8xf32, #tpu.memory_space<vmem>>, vector<32x8xf32>
    %cst_47 = arith.constant dense<0.000000e+00> : vector<32x4xf32>
    %54 = tpu.matmul %53, %52, %cst_47 {dimension_numbers = #tpu.dot_dimension_numbers<[1], [0], [0], [1], [0, 0, 1, 1], [], []>} : vector<32x8xf32>, vector<8x4xf32>, vector<32x4xf32> -> vector<32x4xf32>
    %c0_48 = arith.constant 0 : index
    %c0_49 = arith.constant 0 : index
    %55 = vector.load %arg5[%c0_48, %c0_49] : memref<32x1xf32, #tpu.memory_space<vmem>>, vector<32x1xf32>
    %56 = vector.broadcast %55 : vector<32x1xf32> to vector<32x4xf32>
    %57 = arith.addf %54, %56 : vector<32x4xf32>
    %cst_50 = arith.constant 0.000000e+00 : f32
    %58 = vector.broadcast %cst_50 : f32 to vector<32x4xf32>
    %59 = arith.maximumf %57, %58 : vector<32x4xf32>
    %c0_51 = arith.constant 0 : index
    %c0_52 = arith.constant 0 : index
    %60 = vector.load %arg6[%c0_51, %c0_52] : memref<64x32xf32, #tpu.memory_space<vmem>>, vector<64x32xf32>
    %cst_53 = arith.constant dense<0.000000e+00> : vector<64x4xf32>
    %61 = tpu.matmul %60, %59, %cst_53 {dimension_numbers = #tpu.dot_dimension_numbers<[1], [0], [0], [1], [0, 0, 1, 1], [], []>} : vector<64x32xf32>, vector<32x4xf32>, vector<64x4xf32> -> vector<64x4xf32>
    %c0_54 = arith.constant 0 : index
    %c0_55 = arith.constant 0 : index
    %62 = vector.load %arg7[%c0_54, %c0_55] : memref<64x1xf32, #tpu.memory_space<vmem>>, vector<64x1xf32>
    %63 = vector.broadcast %62 : vector<64x1xf32> to vector<64x4xf32>
    %64 = arith.addf %61, %63 : vector<64x4xf32>
    %cst_56 = arith.constant 0.000000e+00 : f32
    %65 = vector.broadcast %cst_56 : f32 to vector<64x4xf32>
    %66 = arith.maximumf %64, %65 : vector<64x4xf32>
    %c0_57 = arith.constant 0 : index
    %c0_58 = arith.constant 0 : index
    %67 = vector.load %arg8[%c0_57, %c0_58] : memref<16x64xf32, #tpu.memory_space<vmem>>, vector<16x64xf32>
    %cst_59 = arith.constant dense<0.000000e+00> : vector<16x4xf32>
    %68 = tpu.matmul %67, %66, %cst_59 {dimension_numbers = #tpu.dot_dimension_numbers<[1], [0], [0], [1], [0, 0, 1, 1], [], []>} : vector<16x64xf32>, vector<64x4xf32>, vector<16x4xf32> -> vector<16x4xf32>
    %c0_60 = arith.constant 0 : index
    %c0_61 = arith.constant 0 : index
    %69 = vector.load %arg9[%c0_60, %c0_61] : memref<16x1xf32, #tpu.memory_space<vmem>>, vector<16x1xf32>
    %70 = vector.broadcast %69 : vector<16x1xf32> to vector<16x4xf32>
    %71 = arith.addf %68, %70 : vector<16x4xf32>
    %c0_62 = arith.constant 0 : index
    %c0_63 = arith.constant 0 : index
    %72 = vector.load %arg10[%c0_62, %c0_63] : memref<16x4xf32, #tpu.memory_space<vmem>>, vector<16x4xf32>
    tpu.vector_store %arg10[%c0_62, %c0_63], %71 {strides = array<i32>} : memref<16x4xf32, #tpu.memory_space<vmem>>, vector<16x4xf32>,
    return
  }
}

</mosaic_0001>

<bundles_post_ra>
// kernel: siamese_forward.1
= control target key start
LH: loop header
LB: loop body
LE: loop exit
PB: predicated region body
PF: predicated region fallthrough
CT: control target
= control target key end

     0   :  { %s6527_s19 = smov 127   ;;  %v6528_v5 = vmov 0.0   ;;  %s6529_s26 = smov 126   ;;  %vm86_vm0 = vcmask 1039360   ;;  %vm102_vm1 = vcmask 1043456   ;;  %vm98_vm2 = vcmask 31744   ;;  %s7859_s0 = inlined_call_operand.vmem [shape: f32[4,1536], index: 0, kind: input, shape index: {}]   ;;  %s7860_s1 = inlined_call_operand.vmem [shape: f32[9,8,4], index: 1, kind: input, shape index: {}]   ;;  %s7861_s2 = inlined_call_operand.vmem [shape: f32[8,1], index: 2, kind: input, shape index: {}]   ;;  %s7862_s5 = inlined_call_operand.vmem [shape: f32[32,1], index: 5, kind: input, shape index: {}]   ;;  %s7863_s7 = inlined_call_operand.vmem [shape: f32[64,1], index: 7, kind: input, shape index: {}]   ;;  %s7864_s9 = inlined_call_operand.vmem [shape: f32[16,1], index: 9, kind: input, shape index: {}]   ;;  %s7865_s3 = inlined_call_operand.vmem [shape: f32[1408,4], index: 3, kind: input, shape index: {}]   ;;  %s7866_s4 = inlined_call_operand.vmem [shape: f32[32,8], index: 4, kind: input, shape index: {}]   ;;  %s7867_s6 = inlined_call_operand.vmem [shape: f32[64,32], index: 6, kind: input, shape index: {}]   ;;  %s7868_s8 = inlined_call_operand.vmem [shape: f32[16,64], index: 8, kind: input, shape index: {}]   ;;  %s7869_s10 = inlined_call_operand.vmem [shape: f32[16,4], index: 10, kind: output, shape index: {}]  }
   0x1   :  { %v6597_v0 = vld [vmem:[%s7859_s0 + $0x8] sm:$0xff]  ;;  %v6602_v1 = vld [vmem:[%s7859_s0] sm:$0xff]  ;;  %v6607_v2 = vld [vmem:[%s7859_s0 + $0x10] sm:$0xff]  ;;  %189 = vmatprep.mubr.f32.mxu0 %v6528_v5  ;;  %260 = vmatprep.mubr.f32.mxu1 %v6528_v5  ;;  %s6530_s27 = smov 110   ;;  %s6531_s28 = smov 109   ;;  %vm6535_vm3 = vmmov 0  }
   0x2   :  { %66 = vrot.lane.b32.xlu0 %v6597_v0, %s6527_s19  ;;  %62 = vrot.lane.b32.xlu1 %v6602_v1, %s6527_s19  ;;  %v6613_v3 = vcombine.high %v6602_v1, %v6602_v1  ;;  %v6617_v4 = vcombine.high %v6607_v2, %v6607_v2  ;;  %v6623_v6 = vcombine.high %v6597_v0, %v6597_v0  ;;  %v6630_v7 = vld [vmem:[%s7859_s0 + $0x18] sm:$0xff]  ;;  %v6635_v8 = vld [vmem:[%s7859_s0 + $0x20] sm:$0xff]  ;;  %s6532_s29 = smov 108   ;;  %s6533_s30 = smov 92   ;;  %vm1055_vm4 = vcmask 1031168  }
   0x3   :  { %v6641_v9 = vcombine.high %v6635_v8, %v6635_v8  ;;  %v6645_v10 = vcombine.high %v6630_v7, %v6630_v7  ;;  %v6652_v11 = vld [vmem:[%s7859_s0 + $0x28] sm:$0xff]  ;;  %v35_v39 = vld [vmem:[%s7860_s1] sm:$0xff]  ;;  %s6534_s15 = smov 91   ;;  %v6842_v53 = vld [vmem:[%s7860_s1 + $0x10] sm:$0xff]  ;;  %vm1572_vm5 = vcmask 900096   ;;  %vm2089_vm6 = vcmask 891904  }
   0x4   :  { %v6657_v12 = vcombine.high %v6652_v11, %v6652_v11  ;;  %v5680_v19 = vld [vmem:[%s7860_s1 + $0x8] sm:$0xff]  ;;  %vm2606_vm7 = vcmask 883712   ;;  %vm3123_vm8 = vcmask 752640   ;;  %vm3640_vm9 = vcmask 744448  }
   0x5   :  { %v41_v47 = vld [vmem:[%s7859_s0 + $0x28] sm:$0xf]  ;;  %vm4157_vm10 = vcmask 736256   ;;  %vm5282_vm11 = vcmask 64512   ;;  %vm5440_vm12 = vcmask 261120   ;;  %vm5592_vm13 = vcmask 523264  }
   0x6   :  { %72 = vrot.lane.b32.xlu1 %v6617_v4, %s6527_s19  ;;  %64 = vrot.lane.b32.xlu0 %v6613_v3, %s6527_s19 }
   0xa   :  { %68 = vrot.lane.b32.xlu1 %v6623_v6, %s6527_s19  ;;  %74 = vrot.lane.b32.xlu0 %v6630_v7, %s6527_s19 }
   0xe   :  { %80 = vrot.lane.b32.xlu1 %v6641_v9, %s6527_s19  ;;  %70 = vrot.lane.b32.xlu0 %v6607_v2, %s6527_s19 }
  0x12   :  { %76 = vrot.lane.b32.xlu1 %v6645_v10, %s6527_s19  ;;  %82 = vrot.lane.b32.xlu0 %v6652_v11, %s6527_s19 }
  0x16   :  { %84 = vrot.lane.b32.xlu1 %v6657_v12, %s6527_s19  ;;  %78 = vrot.lane.b32.xlu0 %v6635_v8, %s6527_s19  ;;  %s6536_s19 = smov 90  }
  0x1a   :  { %1035 = vrot.lane.b32.xlu1 %v6597_v0, %s6529_s26  ;;  %1033 = vrot.lane.b32.xlu0 %v6613_v3, %s6529_s26 }
  0x1e   :  { %1041 = vrot.lane.b32.xlu1 %v6617_v4, %s6529_s26  ;;  %1031 = vrot.lane.b32.xlu0 %v6602_v1, %s6529_s26 }
  0x22   :  { %1037 = vrot.lane.b32.xlu1 %v6623_v6, %s6529_s26  ;;  %1043 = vrot.lane.b32.xlu0 %v6630_v7, %s6529_s26 }
  0x26   :  { %1049 = vrot.lane.b32.xlu1 %v6641_v9, %s6529_s26  ;;  %1039 = vrot.lane.b32.xlu0 %v6607_v2, %s6529_s26 }
  0x2a   :  { %1045 = vrot.lane.b32.xlu1 %v6645_v10, %s6529_s26  ;;  %1051 = vrot.lane.b32.xlu0 %v6652_v11, %s6529_s26 }
  0x2e   :  { %1550 = vrot.lane.b32.xlu1 %v6613_v3, %s6530_s27  ;;  %1047 = vrot.lane.b32.xlu0 %v6635_v8, %s6529_s26 }
  0x32   :  { %1548 = vrot.lane.b32.xlu1 %v6602_v1, %s6530_s27  ;;  %1552 = vrot.lane.b32.xlu0 %v6597_v0, %s6530_s27 }
  0x36   :  { %1558 = vrot.lane.b32.xlu1 %v6617_v4, %s6530_s27  ;;  %1053 = vrot.lane.b32.xlu0 %v6657_v12, %s6529_s26 }
  0x3a   :  { %1554 = vrot.lane.b32.xlu1 %v6623_v6, %s6530_s27  ;;  %1560 = vrot.lane.b32.xlu0 %v6630_v7, %s6530_s27 }
  0x3e   :  { %1566 = vrot.lane.b32.xlu1 %v6641_v9, %s6530_s27  ;;  %1556 = vrot.lane.b32.xlu0 %v6607_v2, %s6530_s27 }
  0x42   :  { %1562 = vrot.lane.b32.xlu1 %v6645_v10, %s6530_s27  ;;  %1568 = vrot.lane.b32.xlu0 %v6652_v11, %s6530_s27 }
  0x46   :  { %2067 = vrot.lane.b32.xlu1 %v6613_v3, %s6531_s28  ;;  %1564 = vrot.lane.b32.xlu0 %v6635_v8, %s6530_s27 }
  0x4a   :  { %2065 = vrot.lane.b32.xlu1 %v6602_v1, %s6531_s28  ;;  %2069 = vrot.lane.b32.xlu0 %v6597_v0, %s6531_s28 }
  0x4e   :  { %2075 = vrot.lane.b32.xlu1 %v6617_v4, %s6531_s28  ;;  %1570 = vrot.lane.b32.xlu0 %v6657_v12, %s6530_s27 }
  0x52   :  { %2071 = vrot.lane.b32.xlu1 %v6623_v6, %s6531_s28  ;;  %2077 = vrot.lane.b32.xlu0 %v6630_v7, %s6531_s28 }
  0x56   :  { %2083 = vrot.lane.b32.xlu1 %v6641_v9, %s6531_s28  ;;  %2073 = vrot.lane.b32.xlu0 %v6607_v2, %s6531_s28 }
  0x5a   :  { %2079 = vrot.lane.b32.xlu1 %v6645_v10, %s6531_s28  ;;  %2085 = vrot.lane.b32.xlu0 %v6652_v11, %s6531_s28 }
  0x5e   :  { %2584 = vrot.lane.b32.xlu1 %v6613_v3, %s6532_s29  ;;  %2081 = vrot.lane.b32.xlu0 %v6635_v8, %s6531_s28 }
  0x62   :  { %2582 = vrot.lane.b32.xlu1 %v6602_v1, %s6532_s29  ;;  %2586 = vrot.lane.b32.xlu0 %v6597_v0, %s6532_s29 }
  0x66   :  { %2592 = vrot.lane.b32.xlu1 %v6617_v4, %s6532_s29  ;;  %2087 = vrot.lane.b32.xlu0 %v6657_v12, %s6531_s28 }
  0x6a   :  { %2588 = vrot.lane.b32.xlu1 %v6623_v6, %s6532_s29  ;;  %2594 = vrot.lane.b32.xlu0 %v6630_v7, %s6532_s29 }
  0x6e   :  { %2600 = vrot.lane.b32.xlu1 %v6641_v9, %s6532_s29  ;;  %2590 = vrot.lane.b32.xlu0 %v6607_v2, %s6532_s29 }
  0x72   :  { %2596 = vrot.lane.b32.xlu1 %v6645_v10, %s6532_s29  ;;  %2602 = vrot.lane.b32.xlu0 %v6652_v11, %s6532_s29 }
  0x74   :  { %v67_v13 = vpop.permute.xlu0 %66  ;;  %v63_v14 = vpop.permute.xlu1 %62 }
  0x76   :  { %3101 = vrot.lane.b32.xlu1 %v6613_v3, %s6533_s30  ;;  %2598 = vrot.lane.b32.xlu0 %v6635_v8, %s6532_s29 }
  0x78   :  { %v73_v15 = vpop.permute.xlu1 %72  ;;  %v65_v16 = vpop.permute.xlu0 %64 }
  0x79   :  { %v88_v17 = vsel %vm86_vm0, %v65_v16, %v67_v13  ;;  %v87_v18 = vsel %vm86_vm0, %v63_v14, %v65_v16 }
  0x7a   :  { %3099 = vrot.lane.b32.xlu1 %v6602_v1, %s6533_s30  ;;  %3103 = vrot.lane.b32.xlu0 %v6597_v0, %s6533_s30 }
  0x7b   :  { %5681 = vmatprep.subr.msk.mxu0 %vm102_vm1, %v88_v17 }
  0x7c   :  { %5682 = vmatpush1.msk.msra.mxu0 %vm102_vm1, %v87_v18  ;;  %v69_v20 = vpop.permute.xlu1 %68  ;;  %v75_v21 = vpop.permute.xlu0 %74 }
  0x7d   :  { %v92_v22 = vsel %vm86_vm0, %v73_v15, %v75_v21  ;;  %5683 = vmatmul.mubr.msk.f32.vlgmr.msra.gmra.mrb[0].mxu0 %vm98_vm2, %v5680_v19  ;;  %v89_v27 = vsel %vm86_vm0, %v67_v13, %v69_v20 }
  0x7e   :  { %3109 = vrot.lane.b32.xlu1 %v6617_v4, %s6533_s30  ;;  %2604 = vrot.lane.b32.xlu0 %v6657_v12, %s6532_s29 }
  0x7f   :  { %5687 = vmatprep.subr.msk.mxu0 %vm102_vm1, %v92_v22  ;;  %331 = vmatprep.mubr.f32.mxu0 %v6528_v5 }
  0x80   :  { %v81_v23 = vpop.permute.xlu1 %80  ;;  %v71_v24 = vpop.permute.xlu0 %70 }
  0x81   :  { %v91_v25 = vsel %vm86_vm0, %v71_v24, %v73_v15  ;;  %v90_v26 = vsel %vm86_vm0, %v69_v20, %v71_v24 }
  0x82   :  { %3105 = vrot.lane.b32.xlu1 %v6623_v6, %s6533_s30  ;;  %3111 = vrot.lane.b32.xlu0 %v6630_v7, %s6533_s30 }
  0x83   :  { %5684 = vmatprep.subr.msk.mxu1 %vm102_vm1, %v90_v26  ;;  %5688 = vmatpush1.msk.msra.mxu0 %vm102_vm1, %v91_v25 }
  0x84   :  { %5685 = vmatpush1.msk.msra.mxu1 %vm102_vm1, %v89_v27  ;;  %v77_v28 = vpop.permute.xlu1 %76  ;;  %v83_v29 = vpop.permute.xlu0 %82  ;;  %5689 = vmatmul.mubr.msk.f32.vlgmr.msra.gmra.mrb[2].mxu0 %vm98_vm2, %v5680_v19 }
  0x85   :  { %v96_v30 = vsel %vm86_vm0, %v81_v23, %v83_v29  ;;  %5686 = vmatmul.mubr.msk.f32.vlgmr.msra.gmra.mrb[0].mxu1 %vm98_vm2, %v5680_v19  ;;  %473 = vmatprep.mubr.f32.mxu0 %v6528_v5  ;;  %v93_v35 = vsel %vm86_vm0, %v75_v21, %v77_v28 }
  0x86   :  { %3117 = vrot.lane.b32.xlu1 %v6641_v9, %s6533_s30  ;;  %3107 = vrot.lane.b32.xlu0 %v6607_v2, %s6533_s30 }
  0x87   :  { %5693 = vmatprep.subr.msk.mxu0 %vm102_vm1, %v96_v30  ;;  %402 = vmatprep.mubr.f32.mxu1 %v6528_v5 }
  0x88   :  { %v85_v31 = vpop.permute.xlu1 %84  ;;  %v79_v32 = vpop.permute.xlu0 %78 }
  0x89   :  { %v95_v33 = vsel %vm86_vm0, %v79_v32, %v81_v23  ;;  %v94_v34 = vsel %vm86_vm0, %v77_v28, %v79_v32  ;;  %v97_v38 = vsel %vm86_vm0, %v83_v29, %v85_v31 }
  0x8a   :  { %3113 = vrot.lane.b32.xlu1 %v6645_v10, %s6533_s30  ;;  %3119 = vrot.lane.b32.xlu0 %v6652_v11, %s6533_s30 }
  0x8b   :  { %5690 = vmatprep.subr.msk.mxu1 %vm102_vm1, %v94_v34  ;;  %5694 = vmatpush1.msk.msra.mxu0 %vm102_vm1, %v95_v33 }
  0x8c   :  { %5691 = vmatpush1.msk.msra.mxu1 %vm102_vm1, %v93_v35  ;;  %5695 = vmatmul.mubr.msk.f32.vlgmr.msra.gmra.mrb[4].mxu0 %vm98_vm2, %v5680_v19  ;;  %v6772_v36 = vpop.permute.xlu1 %1035  ;;  %v1034_v37 = vpop.permute.xlu0 %1033  ;;  %v6537_v35 = vmov 0  }
  0x8d   :  { %5692 = vmatmul.mubr.msk.f32.vlgmr.msra.gmra.mrb[2].mxu1 %vm98_vm2, %v5680_v19  ;;  %6092 = vmatprep.subr.mxu1 %v6528_v5  ;;  %v1057_v44 = vsel %vm1055_vm4, %v1034_v37, %v6772_v36 }
  0x8e   :  { %6093 = vmatpush3.msk.msra.mxu1 %vm102_vm1, %v97_v38  ;;  %5698 = vmatprep.subr.msk.mxu0 %vm102_vm1, %v6613_v3 }
  0x8f   :  { %3618 = vrot.lane.b32.xlu1 %v6613_v3, %s6534_s15  ;;  %3115 = vrot.lane.b32.xlu0 %v6635_v8, %s6533_s30 }
  0x90   :  { %5699 = vmatpush1.msk.msra.mxu0 %vm102_vm1, %v6602_v1  ;;  %650 = vmatprep.mubr.f32.mxu0 %v6528_v5  ;;  %v1042_v40 = vpop.permute.xlu1 %1041  ;;  %v1032_v41 = vpop.permute.xlu0 %1031 }
  0x91   :  { %6094 = vmatprep.mubr.msk.f32.mxu1 %vm6535_vm3, %v6528_v5  ;;  %5700 = vmatmul.mubr.msk.f32.vlgmr.msra.gmra.mrb[0].mxu0 %vm98_vm2, %v35_v39  ;;  %v1056_v48 = vsel %vm1055_vm4, %v1032_v41, %v1034_v37  ;;  %v4630_v37 = vld [vmem:[%s7861_s2] sm:$0xff]  ;;  %v5260_v41 = vld [vmem:[%s7862_s5 + $0x10] sm:$0xff] }
  0x92   :  { %6095 = vmatmul.mubr.msk.f32.vlgmr.msra.gmra.mrb[4].mxu1 %vm98_vm2, %v5680_v19  ;;  %5704 = vmatprep.subr.msk.mxu0 %vm102_vm1, %v6617_v4 }
  0x93   :  { %5705 = vmatpush1.msk.msra.mxu0 %vm102_vm1, %v6607_v2  ;;  %3616 = vrot.lane.b32.xlu1 %v6602_v1, %s6534_s15 }
  0x94   :  { %3620 = vrot.lane.b32.xlu0 %v6597_v0, %s6534_s15  ;;  %5701 = vmatprep.subr.msk.mxu1 %vm102_vm1, %v6623_v6  ;;  %v1038_v42 = vpop.permute.xlu1 %1037  ;;  %v1044_v43 = vpop.permute.xlu0 %1043 }
  0x95   :  { %792 = vmatprep.mubr.f32.mxu0 %v6528_v5  ;;  %5710 = vmatprep.subr.msk.mxu0 %vm102_vm1, %v6641_v9  ;;  %v1061_v51 = vsel %vm1055_vm4, %v1042_v40, %v1044_v43  ;;  %v1058_v58 = vsel %vm1055_vm4, %v6772_v36, %v1038_v42 }
  0x96   :  { %5702 = vmatpush1.msk.msra.mxu1 %vm102_vm1, %v6597_v0  ;;  %721 = vmatprep.mubr.f32.mxu1 %v6528_v5 }
  0x97   :  { %5706 = vmatmul.mubr.msk.f32.vlgmr.msra.gmra.mrb[2].mxu0 %vm98_vm2, %v35_v39  ;;  %5703 = vmatmul.mubr.msk.f32.vlgmr.msra.gmra.mrb[0].mxu1 %vm98_vm2, %v35_v39 }
  0x98   :  { %5711 = vmatpush1.msk.msra.mxu0 %vm102_vm1, %v6635_v8  ;;  %3626 = vrot.lane.b32.xlu1 %v6617_v4, %s6534_s15  ;;  %v1050_v45 = vpop.permute.xlu1 %1049  ;;  %v1040_v46 = vpop.permute.xlu0 %1039 }
  0x99   :  { %5716 = vmatprep.subr.msk.mxu0 %vm102_vm1, %v1057_v44  ;;  %3121 = vrot.lane.b32.xlu0 %v6657_v12, %s6533_s30  ;;  %v1059_v52 = vsel %vm1055_vm4, %v1038_v42, %v1040_v46  ;;  %v1060_v54 = vsel %vm1055_vm4, %v1040_v46, %v1042_v40 }
  0x9a   :  { %5707 = vmatprep.subr.msk.mxu1 %vm102_vm1, %v6645_v10  ;;  %934 = vmatprep.mubr.f32.mxu0 %v6528_v5 }
  0x9b   :  { %5708 = vmatpush1.msk.msra.mxu1 %vm102_vm1, %v6630_v7  ;;  %863 = vmatprep.mubr.f32.mxu1 %v6528_v5 }
  0x9c   :  { %5712 = vmatmul.mubr.msk.f32.vlgmr.msra.gmra.mrb[4].mxu0 %vm98_vm2, %v35_v39  ;;  %5709 = vmatmul.mubr.msk.f32.vlgmr.msra.gmra.mrb[2].mxu1 %vm98_vm2, %v35_v39  ;;  %v1046_v49 = vpop.permute.xlu1 %1045  ;;  %v1052_v50 = vpop.permute.xlu0 %1051 }
  0x9d   :  { %5717 = vmatpush1.msk.msra.mxu0 %vm102_vm1, %v1056_v48  ;;  %6097 = vmatprep.subr.mxu1 %v6528_v5  ;;  %v1065_v57 = vsel %vm1055_vm4, %v1050_v45, %v1052_v50  ;;  %v1062_v13 = vsel %vm1055_vm4, %v1044_v43, %v1046_v49 }
  0x9e   :  { %5722 = vmatprep.subr.msk.mxu0 %vm102_vm1, %v1061_v51  ;;  %6098 = vmatpush3.msk.msra.mxu1 %vm102_vm1, %v41_v47  ;;  %v5394_v51 = vld [vmem:[%s7863_s7 + $0x10] sm:$0xff] }
  0x9f   :  { %3622 = vrot.lane.b32.xlu1 %v6623_v6, %s6534_s15  ;;  %3628 = vrot.lane.b32.xlu0 %v6630_v7, %s6534_s15 }
  0xa0   :  { %1156 = vmatprep.mubr.f32.mxu0 %v6528_v5  ;;  %5719 = vmatprep.subr.msk.mxu1 %vm102_vm1, %v1059_v52  ;;  %v1551_v55 = vpop.permute.xlu1 %1550  ;;  %v1048_v56 = vpop.permute.xlu0 %1047 }
  0xa1   :  { %6099 = vmatprep.mubr.msk.f32.mxu1 %vm6535_vm3, %v6528_v5  ;;  %5718 = vmatmul.mubr.msk.f32.vlgmr.msra.gmra.mrb[0].mxu0 %vm98_vm2, %v6842_v53  ;;  %v1063_v59 = vsel %vm1055_vm4, %v1046_v49, %v1048_v56  ;;  %v1064_v60 = vsel %vm1055_vm4, %v1048_v56, %v1050_v45  ;;  %v5392_v45 = vld [vmem:[%s7863_s7] sm:$0xff]  ;;  %v7031_v56 = vld [vmem:[%s7860_s1 + $0x28] sm:$0xff] }
  0xa2   :  { %5723 = vmatpush1.msk.msra.mxu0 %vm102_vm1, %v1060_v54  ;;  %6100 = vmatmul.mubr.msk.f32.vlgmr.msra.gmra.mrb[6].mxu1 %vm98_vm2, %v35_v39 }
  0xa3   :  { %5720 = vmatpush1.msk.msra.mxu1 %vm102_vm1, %v1058_v58  ;;  %3634 = vrot.lane.b32.xlu1 %v6641_v9, %s6534_s15 }
  0xa4   :  { %3624 = vrot.lane.b32.xlu0 %v6607_v2, %s6534_s15  ;;  %5728 = vmatprep.subr.msk.mxu0 %vm102_vm1, %v1065_v57  ;;  %v1549_v61 = vpop.permute.xlu1 %1548  ;;  %v1553_v62 = vpop.permute.xlu0 %1552  ;;  %v5396_v57 = vld [vmem:[%s7863_s7 + $0x20] sm:$0xff] }
  0xa5   :  { %1298 = vmatprep.mubr.f32.mxu0 %v6528_v5  ;;  %1227 = vmatprep.mubr.f32.mxu1 %v6528_v5  ;;  %v1574_v63 = vsel %vm1572_vm5, %v1551_v55, %v1553_v62  ;;  %v1573_v14 = vsel %vm1572_vm5, %v1549_v61, %v1551_v55  ;;  %v5398_v61 = vld [vmem:[%s7863_s7 + $0x30] sm:$0xff] }
  0xa6   :  { %5724 = vmatmul.mubr.msk.f32.vlgmr.msra.gmra.mrb[2].mxu0 %vm98_vm2, %v6842_v53  ;;  %5725 = vmatprep.subr.msk.mxu1 %vm102_vm1, %v1063_v59 }
  0xa7   :  { %3630 = vrot.lane.b32.xlu1 %v6645_v10, %s6534_s15  ;;  %5729 = vmatpush1.msk.msra.mxu0 %vm102_vm1, %v1064_v60 }
  0xa8   :  { %3636 = vrot.lane.b32.xlu0 %v6652_v11, %s6534_s15  ;;  %5721 = vmatmul.mubr.msk.f32.vlgmr.msra.gmra.mrb[0].mxu1 %vm98_vm2, %v6842_v53  ;;  %v1559_v15 = vpop.permute.xlu1 %1558  ;;  %v1054_v16 = vpop.permute.xlu0 %1053 }
  0xa9   :  { %5726 = vmatpush1.msk.msra.mxu1 %vm102_vm1, %v1062_v13  ;;  %1440 = vmatprep.mubr.f32.mxu0 %v6528_v5  ;;  %v1066_v17 = vsel %vm1055_vm4, %v1052_v50, %v1054_v16 }
  0xaa   :  { %5734 = vmatprep.subr.msk.mxu0 %vm102_vm1, %v1574_v63  ;;  %5730 = vmatmul.mubr.msk.f32.vlgmr.msra.gmra.mrb[4].mxu0 %vm98_vm2, %v6842_v53 }
  0xab   :  { %4135 = vrot.lane.b32.xlu1 %v6613_v3, %s6536_s19  ;;  %5735 = vmatpush1.msk.msra.mxu0 %vm102_vm1, %v1573_v14  ;;  %v6904_v3 = vld [vmem:[%s7860_s1 + $0x18] sm:$0xff] }
  0xac   :  { %3632 = vrot.lane.b32.xlu0 %v6635_v8, %s6534_s15  ;;  %1369 = vmatprep.mubr.f32.mxu1 %v6528_v5  ;;  %v1555_v18 = vpop.permute.xlu1 %1554  ;;  %v1561_v19 = vpop.permute.xlu0 %1560 }
  0xad   :  { %6102 = vmatprep.subr.mxu1 %v6528_v5  ;;  %5727 = vmatmul.mubr.msk.f32.vlgmr.msra.gmra.mrb[2].mxu1 %vm98_vm2, %v6842_v53  ;;  %v1578_v20 = vsel %vm1572_vm5, %v1559_v15, %v1561_v19 }
  0xae   :  { %6103 = vmatpush3.msk.msra.mxu1 %vm102_vm1, %v1066_v17  ;;  %5740 = vmatprep.subr.msk.mxu0 %vm102_vm1, %v1578_v20 }
  0xaf   :  { %4133 = vrot.lane.b32.xlu1 %v6602_v1, %s6536_s19  ;;  %1673 = vmatprep.mubr.f32.mxu0 %v6528_v5  ;;  %v1575_v1 = vsel %vm1572_vm5, %v1553_v62, %v1555_v18 }
  0xb0   :  { %4137 = vrot.lane.b32.xlu0 %v6597_v0, %s6536_s19  ;;  %v1567_v21 = vpop.permute.xlu1 %1566  ;;  %v1557_v22 = vpop.permute.xlu0 %1556  ;;  %6104 = vmatprep.mubr.msk.f32.mxu1 %vm6535_vm3, %v6528_v5 }
  0xb1   :  { %v1576_v23 = vsel %vm1572_vm5, %v1555_v18, %v1557_v22  ;;  %v1577_v24 = vsel %vm1572_vm5, %v1557_v22, %v1559_v15  ;;  %5736 = vmatmul.mubr.msk.f32.vlgmr.msra.gmra.mrb[0].mxu0 %vm98_vm2, %v6904_v3  ;;  %6105 = vmatmul.mubr.msk.f32.vlgmr.msra.gmra.mrb[8].mxu1 %vm98_vm2, %v6842_v53 }
  0xb2   :  { %5737 = vmatprep.subr.msk.mxu1 %vm102_vm1, %v1576_v23  ;;  %5741 = vmatpush1.msk.msra.mxu0 %vm102_vm1, %v1577_v24 }
  0xb3   :  { %4139 = vrot.lane.b32.xlu1 %v6623_v6, %s6536_s19  ;;  %5738 = vmatpush1.msk.msra.mxu1 %vm102_vm1, %v1575_v1 }
  0xb4   :  { %3638 = vrot.lane.b32.xlu0 %v6657_v12, %s6534_s15  ;;  %v1563_v0 = vpop.permute.xlu1 %1562  ;;  %v1569_v25 = vpop.permute.xlu0 %1568  ;;  %1815 = vmatprep.mubr.f32.mxu0 %v6528_v5 }
  0xb5   :  { %v1582_v26 = vsel %vm1572_vm5, %v1567_v21, %v1569_v25  ;;  %1744 = vmatprep.mubr.f32.mxu1 %v6528_v5  ;;  %5742 = vmatmul.mubr.msk.f32.vlgmr.msra.gmra.mrb[2].mxu0 %vm98_vm2, %v6904_v3  ;;  %v1579_v30 = vsel %vm1572_vm5, %v1561_v19, %v1563_v0  ;;  %v5580_v19 = vld [vmem:[%s7864_s9] sm:$0xff] }
  0xb6   :  { %5746 = vmatprep.subr.msk.mxu0 %vm102_vm1, %v1582_v26  ;;  %5739 = vmatmul.mubr.msk.f32.vlgmr.msra.gmra.mrb[0].mxu1 %vm98_vm2, %v6904_v3 }
  0xb7   :  { %4143 = vrot.lane.b32.xlu1 %v6617_v4, %s6536_s19  ;;  %1957 = vmatprep.mubr.f32.mxu0 %v6528_v5 }
  0xb8   :  { %4141 = vrot.lane.b32.xlu0 %v6607_v2, %s6536_s19  ;;  %v2068_v6 = vpop.permute.xlu1 %2067  ;;  %v1565_v27 = vpop.permute.xlu0 %1564  ;;  %1886 = vmatprep.mubr.f32.mxu1 %v6528_v5 }
  0xb9   :  { %v1580_v28 = vsel %vm1572_vm5, %v1563_v0, %v1565_v27  ;;  %v1581_v29 = vsel %vm1572_vm5, %v1565_v27, %v1567_v21  ;;  %6519 = vset.pattern.permute.xlu0 %v6537_v35  ;;  %6520 = vset.pattern.permute.xlu1 %v6537_v35 }
  0xba   :  { %5743 = vmatprep.subr.msk.mxu1 %vm102_vm1, %v1580_v28  ;;  %5747 = vmatpush1.msk.msra.mxu0 %vm102_vm1, %v1581_v29  ;;  %v5787_v28 = vld [vmem:[%s7860_s1 + $0x30] sm:$0xff] }
  0xbb   :  { %4147 = vrot.lane.b32.xlu1 %v6645_v10, %s6536_s19  ;;  %5744 = vmatpush1.msk.msra.mxu1 %vm102_vm1, %v1579_v30 }
  0xbc   :  { %4145 = vrot.lane.b32.xlu0 %v6630_v7, %s6536_s19  ;;  %v2066_v2 = vpop.permute.xlu1 %2065  ;;  %v2070_v4 = vpop.permute.xlu0 %2069  ;;  %5748 = vmatmul.mubr.msk.f32.vlgmr.msra.gmra.mrb[4].mxu0 %vm98_vm2, %v6904_v3  ;;  %v6963_v7 = vld [vmem:[%s7860_s1 + $0x20] sm:$0xff] }
  0xbd   :  { %v2090_v31 = vsel %vm2089_vm6, %v2066_v2, %v2068_v6  ;;  %v2091_v32 = vsel %vm2089_vm6, %v2068_v6, %v2070_v4  ;;  %6107 = vmatprep.subr.mxu1 %v6528_v5  ;;  %5745 = vmatmul.mubr.msk.f32.vlgmr.msra.gmra.mrb[2].mxu1 %vm98_vm2, %v6904_v3 }
  0xbe   :  { %5752 = vmatprep.subr.msk.mxu0 %vm102_vm1, %v2091_v32  ;;  %2190 = vmatprep.mubr.f32.mxu0 %v6528_v5 }
  0xbf   :  { %4151 = vrot.lane.b32.xlu1 %v6641_v9, %s6536_s19  ;;  %5753 = vmatpush1.msk.msra.mxu0 %vm102_vm1, %v2090_v31 }
  0xc0   :  { %4149 = vrot.lane.b32.xlu0 %v6635_v8, %s6536_s19  ;;  %v2076_v10 = vpop.permute.xlu1 %2075  ;;  %v1571_v33 = vpop.permute.xlu0 %1570  ;;  %6109 = vmatprep.mubr.msk.f32.mxu1 %vm6535_vm3, %v6528_v5 }
  0xc1   :  { %v1583_v34 = vsel %vm1572_vm5, %v1569_v25, %v1571_v33  ;;  %5754 = vmatmul.mubr.msk.f32.vlgmr.msra.gmra.mrb[0].mxu0 %vm98_vm2, %v6963_v7 }
  0xc2   :  { %6108 = vmatpush3.msk.msra.mxu1 %vm102_vm1, %v1583_v34  ;;  %2332 = vmatprep.mubr.f32.mxu0 %v6528_v5 }
  0xc3   :  { %4155 = vrot.lane.b32.xlu1 %v6657_v12, %s6536_s19  ;;  %6110 = vmatmul.mubr.msk.f32.vlgmr.msra.gmra.mrb[10].mxu1 %vm98_vm2, %v6904_v3 }
  0xc4   :  { %4153 = vrot.lane.b32.xlu0 %v6652_v11, %s6536_s19  ;;  %v2072_v8 = vpop.permute.xlu1 %2071  ;;  %v2078_v9 = vpop.permute.xlu0 %2077  ;;  %2261 = vmatprep.mubr.f32.mxu1 %v6528_v5 }
  0xc5   :  { %v2095_v36 = vsel %vm2089_vm6, %v2076_v10, %v2078_v9  ;;  %v2092_v40 = vsel %vm2089_vm6, %v2070_v4, %v2072_v8 }
  0xc6   :  { %5758 = vmatprep.subr.msk.mxu0 %vm102_vm1, %v2095_v36 }
  0xc8   :  { %v2084_v12 = vpop.permute.xlu1 %2083  ;;  %v2074_v38 = vpop.permute.xlu0 %2073  ;;  %4633 = vperm.xlu0 %6519, %v4630_v37  }
  0xc9   :  { %v2093_v39 = vsel %vm2089_vm6, %v2072_v8, %v2074_v38  ;;  %v2094_v11 = vsel %vm2089_vm6, %v2074_v38, %v2076_v10 }
  0xca   :  { %5755 = vmatprep.subr.msk.mxu1 %vm102_vm1, %v2093_v39  ;;  %5759 = vmatpush1.msk.msra.mxu0 %vm102_vm1, %v2094_v11 }
  0xcb   :  { %5756 = vmatpush1.msk.msra.mxu1 %vm102_vm1, %v2092_v40  ;;  %5760 = vmatmul.mubr.msk.f32.vlgmr.msra.gmra.mrb[2].mxu0 %vm98_vm2, %v6963_v7 }
  0xcc   :  { %v2080_v42 = vpop.permute.xlu1 %2079  ;;  %v2086_v43 = vpop.permute.xlu0 %2085  ;;  %5757 = vmatmul.mubr.msk.f32.vlgmr.msra.gmra.mrb[0].mxu1 %vm98_vm2, %v6963_v7  ;;  %2474 = vmatprep.mubr.f32.mxu0 %v6528_v5 }
  0xcd   :  { %v2099_v44 = vsel %vm2089_vm6, %v2084_v12, %v2086_v43  ;;  %2403 = vmatprep.mubr.f32.mxu1 %v6528_v5  ;;  %5274 = vperm.xlu0 %6519, %v5260_v41   ;;  %v2096_v50 = vsel %vm2089_vm6, %v2078_v9, %v2080_v42 }
  0xce   :  { %5764 = vmatprep.subr.msk.mxu0 %vm102_vm1, %v2099_v44  ;;  %v5805_v44 = vld [vmem:[%s7860_s1 + $0x38] sm:$0xff] }
  0xd0   :  { %v2585_v46 = vpop.permute.xlu1 %2584  ;;  %v2082_v47 = vpop.permute.xlu0 %2081 }
  0xd1   :  { %v2097_v48 = vsel %vm2089_vm6, %v2080_v42, %v2082_v47  ;;  %v2098_v49 = vsel %vm2089_vm6, %v2082_v47, %v2084_v12  ;;  %5402 = vperm.xlu0 %6519, %v5392_v45  }
  0xd2   :  { %5761 = vmatprep.subr.msk.mxu1 %vm102_vm1, %v2097_v48  ;;  %5765 = vmatpush1.msk.msra.mxu0 %vm102_vm1, %v2098_v49 }
  0xd3   :  { %5762 = vmatpush1.msk.msra.mxu1 %vm102_vm1, %v2096_v50  ;;  %5766 = vmatmul.mubr.msk.f32.vlgmr.msra.gmra.mrb[4].mxu0 %vm98_vm2, %v6963_v7 }
  0xd4   :  { %v2583_v52 = vpop.permute.xlu1 %2582  ;;  %v2587_v53 = vpop.permute.xlu0 %2586  ;;  %5763 = vmatmul.mubr.msk.f32.vlgmr.msra.gmra.mrb[2].mxu1 %vm98_vm2, %v6963_v7  ;;  %6112 = vmatprep.subr.mxu1 %v6528_v5 }
  0xd5   :  { %v2607_v54 = vsel %vm2606_vm7, %v2583_v52, %v2585_v46  ;;  %v2608_v55 = vsel %vm2606_vm7, %v2585_v46, %v2587_v53  ;;  %6114 = vmatprep.mubr.msk.f32.mxu1 %vm6535_vm3, %v6528_v5  ;;  %2707 = vmatprep.mubr.f32.mxu0 %v6528_v5 }
  0xd6   :  { %5770 = vmatprep.subr.msk.mxu0 %vm102_vm1, %v2608_v55  ;;  %5412 = vperm.xlu0 %6519, %v5394_v51  }
  0xd7   :  { %5771 = vmatpush1.msk.msra.mxu0 %vm102_vm1, %v2607_v54 }
  0xd8   :  { %v2593_v58 = vpop.permute.xlu1 %2592  ;;  %v2088_v59 = vpop.permute.xlu0 %2087  ;;  %5772 = vmatmul.mubr.msk.f32.vlgmr.msra.gmra.mrb[0].mxu0 %vm98_vm2, %v7031_v56 }
  0xd9   :  { %v2100_v60 = vsel %vm2089_vm6, %v2086_v43, %v2088_v59  ;;  %2849 = vmatprep.mubr.f32.mxu0 %v6528_v5 }
  0xda   :  { %6113 = vmatpush3.msk.msra.mxu1 %vm102_vm1, %v2100_v60  ;;  %5422 = vperm.xlu0 %6519, %v5396_v57  }
  0xdb   :  { %6115 = vmatmul.mubr.msk.f32.vlgmr.msra.gmra.mrb[12].mxu1 %vm98_vm2, %v6963_v7 }
  0xdc   :  { %v2589_v62 = vpop.permute.xlu1 %2588  ;;  %v2595_v63 = vpop.permute.xlu0 %2594  ;;  %2778 = vmatprep.mubr.f32.mxu1 %v6528_v5 }
  0xdd   :  { %v2612_v13 = vsel %vm2606_vm7, %v2593_v58, %v2595_v63  ;;  %v2609_v18 = vsel %vm2606_vm7, %v2587_v53, %v2589_v62 }
  0xde   :  { %5776 = vmatprep.subr.msk.mxu0 %vm102_vm1, %v2612_v13  ;;  %5432 = vperm.xlu0 %6519, %v5398_v61  }
  0xe0   :  { %v2601_v14 = vpop.permute.xlu1 %2600  ;;  %v2591_v15 = vpop.permute.xlu0 %2590 }
  0xe1   :  { %v2610_v16 = vsel %vm2606_vm7, %v2589_v62, %v2591_v15  ;;  %v2611_v17 = vsel %vm2606_vm7, %v2591_v15, %v2593_v58 }
  0xe2   :  { %5773 = vmatprep.subr.msk.mxu1 %vm102_vm1, %v2610_v16  ;;  %5777 = vmatpush1.msk.msra.mxu0 %vm102_vm1, %v2611_v17  ;;  %v5823_v17 = vld [vmem:[%s7860_s1 + $0x40] sm:$0xff] }
  0xe3   :  { %5774 = vmatpush1.msk.msra.mxu1 %vm102_vm1, %v2609_v18  ;;  %5778 = vmatmul.mubr.msk.f32.vlgmr.msra.gmra.mrb[2].mxu0 %vm98_vm2, %v7031_v56 }
  0xe4   :  { %v2597_v20 = vpop.permute.xlu1 %2596  ;;  %v2603_v3 = vpop.permute.xlu0 %2602  ;;  %5775 = vmatmul.mubr.msk.f32.vlgmr.msra.gmra.mrb[0].mxu1 %vm98_vm2, %v7031_v56  ;;  %2991 = vmatprep.mubr.f32.mxu0 %v6528_v5 }
  0xe5   :  { %v2616_v21 = vsel %vm2606_vm7, %v2601_v14, %v2603_v3  ;;  %2920 = vmatprep.mubr.f32.mxu1 %v6528_v5  ;;  %5584 = vperm.xlu0 %6519, %v5580_v19   ;;  %v2613_v0 = vsel %vm2606_vm7, %v2595_v63, %v2597_v20 }
  0xe6   :  { %5782 = vmatprep.subr.msk.mxu0 %vm102_vm1, %v2616_v21 }
  0xe8   :  { %v3102_v22 = vpop.permute.xlu1 %3101  ;;  %v2599_v23 = vpop.permute.xlu0 %2598 }
  0xe9   :  { %v2614_v24 = vsel %vm2606_vm7, %v2597_v20, %v2599_v23  ;;  %v2615_v1 = vsel %vm2606_vm7, %v2599_v23, %v2601_v14 }
  0xea   :  { %5779 = vmatprep.subr.msk.mxu1 %vm102_vm1, %v2614_v24  ;;  %5783 = vmatpush1.msk.msra.mxu0 %vm102_vm1, %v2615_v1 }
  0xeb   :  { %5780 = vmatpush1.msk.msra.mxu1 %vm102_vm1, %v2613_v0  ;;  %5784 = vmatmul.mubr.msk.f32.vlgmr.msra.gmra.mrb[4].mxu0 %vm98_vm2, %v7031_v56 }
  0xec   :  { %v3100_v25 = vpop.permute.xlu1 %3099  ;;  %v3104_v26 = vpop.permute.xlu0 %3103  ;;  %5781 = vmatmul.mubr.msk.f32.vlgmr.msra.gmra.mrb[2].mxu1 %vm98_vm2, %v7031_v56  ;;  %6117 = vmatprep.subr.mxu1 %v6528_v5 }
  0xed   :  { %v3124_v6 = vsel %vm3123_vm8, %v3100_v25, %v3102_v22  ;;  %v3125_v27 = vsel %vm3123_vm8, %v3102_v22, %v3104_v26  ;;  %6119 = vmatprep.mubr.msk.f32.mxu1 %vm6535_vm3, %v6528_v5  ;;  %3224 = vmatprep.mubr.f32.mxu0 %v6528_v5 }
  0xee   :  { %5788 = vmatprep.subr.msk.mxu0 %vm102_vm1, %v3125_v27 }
  0xef   :  { %5789 = vmatpush1.msk.msra.mxu0 %vm102_vm1, %v3124_v6 }
  0xf0   :  { %v3110_v29 = vpop.permute.xlu1 %3109  ;;  %v2605_v30 = vpop.permute.xlu0 %2604  ;;  %5790 = vmatmul.mubr.msk.f32.vlgmr.msra.gmra.mrb[0].mxu0 %vm98_vm2, %v5787_v28 }
  0xf1   :  { %v2617_v2 = vsel %vm2606_vm7, %v2603_v3, %v2605_v30  ;;  %3366 = vmatprep.mubr.f32.mxu0 %v6528_v5 }
  0xf2   :  { %6118 = vmatpush3.msk.msra.mxu1 %vm102_vm1, %v2617_v2 }
  0xf3   :  { %6120 = vmatmul.mubr.msk.f32.vlgmr.msra.gmra.mrb[14].mxu1 %vm98_vm2, %v7031_v56 }
  0xf4   :  { %v3106_v4 = vpop.permute.xlu1 %3105  ;;  %v3112_v31 = vpop.permute.xlu0 %3111  ;;  %3295 = vmatprep.mubr.f32.mxu1 %v6528_v5 }
  0xf5   :  { %v3129_v32 = vsel %vm3123_vm8, %v3110_v29, %v3112_v31  ;;  %v3126_v35 = vsel %vm3123_vm8, %v3104_v26, %v3106_v4 }
  0xf6   :  { %5794 = vmatprep.subr.msk.mxu0 %vm102_vm1, %v3129_v32  ;;  %v4674_v32 = vld [vmem:[%s7865_s3 + $0x80] sm:$0xff] }
  0xf8   :  { %v3118_v7 = vpop.permute.xlu1 %3117  ;;  %v3108_v10 = vpop.permute.xlu0 %3107 }
  0xf9   :  { %v3127_v33 = vsel %vm3123_vm8, %v3106_v4, %v3108_v10  ;;  %v3128_v34 = vsel %vm3123_vm8, %v3108_v10, %v3110_v29  ;;  %v4658_v10 = vld [vmem:[%s7865_s3] sm:$0xff] }
  0xfa   :  { %5791 = vmatprep.subr.msk.mxu1 %vm102_vm1, %v3127_v33  ;;  %5795 = vmatpush1.msk.msra.mxu0 %vm102_vm1, %v3128_v34  ;;  %v4659_v34 = vld [vmem:[%s7865_s3 + $0x8] sm:$0xff] }
  0xfb   :  { %5792 = vmatpush1.msk.msra.mxu1 %vm102_vm1, %v3126_v35  ;;  %5796 = vmatmul.mubr.msk.f32.vlgmr.msra.gmra.mrb[2].mxu0 %vm98_vm2, %v5787_v28  ;;  %v4676_v35 = vld [vmem:[%s7865_s3 + $0x90] sm:$0xff] }
  0xfc   :  { %v3114_v8 = vpop.permute.xlu1 %3113  ;;  %v3120_v9 = vpop.permute.xlu0 %3119  ;;  %5793 = vmatmul.mubr.msk.f32.vlgmr.msra.gmra.mrb[0].mxu1 %vm98_vm2, %v5787_v28  ;;  %3508 = vmatprep.mubr.f32.mxu0 %v6528_v5 }
  0xfd   :  { %v3133_v36 = vsel %vm3123_vm8, %v3118_v7, %v3120_v9  ;;  %3437 = vmatprep.mubr.f32.mxu1 %v6528_v5  ;;  %v3130_v11 = vsel %vm3123_vm8, %v3112_v31, %v3114_v8 }
  0xfe   :  { %5800 = vmatprep.subr.msk.mxu0 %vm102_vm1, %v3133_v36 }
 0x101   :  { %v3619_v37 = vpop.permute.xlu1 %3618  ;;  %v3116_v12 = vpop.permute.xlu0 %3115 }
 0x102   :  { %v3131_v38 = vsel %vm3123_vm8, %v3114_v8, %v3116_v12  ;;  %v3132_v39 = vsel %vm3123_vm8, %v3116_v12, %v3118_v7  ;;  %v4675_v7 = vld [vmem:[%s7865_s3 + $0x88] sm:$0xff]  ;;  %v4677_v8 = vld [vmem:[%s7865_s3 + $0x98] sm:$0xff] }
 0x103   :  { %5797 = vmatprep.subr.msk.mxu1 %vm102_vm1, %v3131_v38  ;;  %5801 = vmatpush1.msk.msra.mxu0 %vm102_vm1, %v3132_v39  ;;  %v6219_v33 = vpack.c.bf16 %v4675_v7, %v4674_v32  ;;  %v6223_v36 = vpack.c.bf16 %v4677_v8, %v4676_v35  ;;  %v4661_v12 = vld [vmem:[%s7865_s3 + $0x18] sm:$0xff]  ;;  %v4678_v38 = vld [vmem:[%s7865_s3 + $0xa0] sm:$0xff]  ;;  %v4687_v32 = vld [vmem:[%s7865_s3 + $0xe8] sm:$0xff] }
 0x104   :  { %5798 = vmatpush1.msk.msra.mxu1 %vm102_vm1, %v3130_v11  ;;  %5802 = vmatmul.mubr.msk.f32.vlgmr.msra.gmra.mrb[4].mxu0 %vm98_vm2, %v5787_v28  ;;  %v4679_v11 = vld [vmem:[%s7865_s3 + $0xa8] sm:$0xff] }
 0x105   :  { %v3617_v40 = vpop.permute.xlu1 %3616  ;;  %5799 = vmatmul.mubr.msk.f32.vlgmr.msra.gmra.mrb[2].mxu1 %vm98_vm2, %v5787_v28  ;;  %6122 = vmatprep.subr.mxu1 %v6528_v5  ;;  %v4699_v35 = vld [vmem:[%s7865_s3 + $0x148] sm:$0xff] }
 0x106   :  { %v3641_v41 = vsel %vm3640_vm9, %v3617_v40, %v3619_v37  ;;  %v3621_v42 = vpop.permute.xlu0 %3620  ;;  %6124 = vmatprep.mubr.msk.f32.mxu1 %vm6535_vm3, %v6528_v5  ;;  %3741 = vmatprep.mubr.f32.mxu0 %v6528_v5  ;;  %v4706_v40 = vld [vmem:[%s7865_s3 + $0x180] sm:$0xff] }
 0x107   :  { %v3642_v43 = vsel %vm3640_vm9, %v3619_v37, %v3621_v42  ;;  %v4660_v37 = vld [vmem:[%s7865_s3 + $0x10] sm:$0xff] }
 0x108   :  { %5806 = vmatprep.subr.msk.mxu0 %vm102_vm1, %v3642_v43  ;;  %v6225_v39 = vpack.c.bf16 %v4661_v12, %v4660_v37 }
 0x109   :  { %5807 = vmatpush1.msk.msra.mxu0 %vm102_vm1, %v3641_v41  ;;  %v4707_v41 = vld [vmem:[%s7865_s3 + $0x188] sm:$0xff] }
 0x10a   :  { %5808 = vmatmul.mubr.msk.f32.vlgmr.msra.gmra.mrb[0].mxu0 %vm98_vm2, %v5805_v44  ;;  %v3627_v45 = vpop.permute.xlu1 %3626  ;;  %v6251_v43 = vpack.c.bf16 %v4707_v41, %v4706_v40  ;;  %v4688_v40 = vld [vmem:[%s7865_s3 + $0xf0] sm:$0xff]  ;;  %v4689_v41 = vld [vmem:[%s7865_s3 + $0xf8] sm:$0xff] }
 0x10b   :  { %v3122_v46 = vpop.permute.xlu0 %3121  ;;  %3883 = vmatprep.mubr.f32.mxu0 %v6528_v5 }
 0x10c   :  { %v3134_v47 = vsel %vm3123_vm8, %v3120_v9, %v3122_v46  ;;  %v6221_v9 = vpack.c.bf16 %v4659_v34, %v4658_v10  ;;  %v4690_v46 = vld [vmem:[%s7865_s3 + $0x100] sm:$0xff] }
 0x10d   :  { %6123 = vmatpush3.msk.msra.mxu1 %vm102_vm1, %v3134_v47  ;;  %v4698_v34 = vld [vmem:[%s7865_s3 + $0x140] sm:$0xff] }
 0x10e   :  { %6125 = vmatmul.mubr.msk.f32.vlgmr.msra.gmra.mrb[16].mxu1 %vm98_vm2, %v5787_v28  ;;  %v6269_v37 = vpack.c.bf16 %v4699_v35, %v4698_v34  ;;  %v4741_v34 = vld [vmem:[%s7865_s3 + $0x298] sm:$0xff] }
 0x10f   :  { %3812 = vmatprep.mubr.f32.mxu1 %v6528_v5 }
 0x111   :  { %v3623_v48 = vpop.permute.xlu1 %3622  ;;  %v3629_v49 = vpop.permute.xlu0 %3628 }
 0x112   :  { %v3646_v50 = vsel %vm3640_vm9, %v3627_v45, %v3629_v49  ;;  %v3643_v55 = vsel %vm3640_vm9, %v3621_v42, %v3623_v48  ;;  %v6227_v42 = vpack.c.bf16 %v4679_v11, %v4678_v38 }
 0x113   :  { %5812 = vmatprep.subr.msk.mxu0 %vm102_vm1, %v3646_v50  ;;  %v4680_v50 = vld [vmem:[%s7865_s3 + $0xb0] sm:$0xff] }
 0x115   :  { %v3635_v51 = vpop.permute.xlu1 %3634 }
 0x116   :  { %v3625_v52 = vpop.permute.xlu0 %3624 }
 0x117   :  { %v3644_v53 = vsel %vm3640_vm9, %v3623_v48, %v3625_v52  ;;  %v3645_v54 = vsel %vm3640_vm9, %v3625_v52, %v3627_v45  ;;  %v4663_v45 = vld [vmem:[%s7865_s3 + $0x28] sm:$0xff] }
 0x118   :  { %5809 = vmatprep.subr.msk.mxu1 %vm102_vm1, %v3644_v53  ;;  %5813 = vmatpush1.msk.msra.mxu0 %vm102_vm1, %v3645_v54 }
 0x119   :  { %5810 = vmatpush1.msk.msra.mxu1 %vm102_vm1, %v3643_v55  ;;  %v3631_v56 = vpop.permute.xlu1 %3630  ;;  %5814 = vmatmul.mubr.msk.f32.vlgmr.msra.gmra.mrb[2].mxu0 %vm98_vm2, %v5805_v44  ;;  %v4708_v55 = vld [vmem:[%s7865_s3 + $0x190] sm:$0xff] }
 0x11a   :  { %v3637_v57 = vpop.permute.xlu0 %3636  ;;  %5811 = vmatmul.mubr.msk.f32.vlgmr.msra.gmra.mrb[0].mxu1 %vm98_vm2, %v5805_v44  ;;  %4025 = vmatprep.mubr.f32.mxu0 %v6528_v5  ;;  %v3647_v63 = vsel %vm3640_vm9, %v3629_v49, %v3631_v56  ;;  %v4691_v49 = vld [vmem:[%s7865_s3 + $0x108] sm:$0xff] }
 0x11b   :  { %v3650_v58 = vsel %vm3640_vm9, %v3635_v51, %v3637_v57  ;;  %3954 = vmatprep.mubr.f32.mxu1 %v6528_v5  ;;  %v6253_v53 = vpack.c.bf16 %v4691_v49, %v4690_v46  ;;  %v4673_v46 = vld [vmem:[%s7865_s3 + $0x78] sm:$0xff]  ;;  %v4700_v49 = vld [vmem:[%s7865_s3 + $0x150] sm:$0xff] }
 0x11c   :  { %5818 = vmatprep.subr.msk.mxu0 %vm102_vm1, %v3650_v58 }
 0x11d   :  { %v4136_v59 = vpop.permute.xlu1 %4135 }
 0x11e   :  { %v3633_v60 = vpop.permute.xlu0 %3632 }
 0x11f   :  { %v3648_v61 = vsel %vm3640_vm9, %v3631_v56, %v3633_v60  ;;  %v3649_v62 = vsel %vm3640_vm9, %v3633_v60, %v3635_v51  ;;  %v4681_v51 = vld [vmem:[%s7865_s3 + $0xb8] sm:$0xff]  ;;  %v4692_v60 = vld [vmem:[%s7865_s3 + $0x110] sm:$0xff] }
 0x120   :  { %5815 = vmatprep.subr.msk.mxu1 %vm102_vm1, %v3648_v61  ;;  %5819 = vmatpush1.msk.msra.mxu0 %vm102_vm1, %v3649_v62  ;;  %v6231_v54 = vpack.c.bf16 %v4681_v51, %v4680_v50  ;;  %v4709_v56 = vld [vmem:[%s7865_s3 + $0x198] sm:$0xff] }
 0x121   :  { %5816 = vmatpush1.msk.msra.mxu1 %vm102_vm1, %v3647_v63  ;;  %v4134_v13 = vpop.permute.xlu1 %4133  ;;  %5820 = vmatmul.mubr.msk.f32.vlgmr.msra.gmra.mrb[4].mxu0 %vm98_vm2, %v5805_v44  ;;  %v6255_v58 = vpack.c.bf16 %v4709_v56, %v4708_v55  ;;  %v4693_v61 = vld [vmem:[%s7865_s3 + $0x118] sm:$0xff]  ;;  %v4682_v63 = vld [vmem:[%s7865_s3 + $0xc0] sm:$0xff]  ;;  %v4739_v56 = vld [vmem:[%s7865_s3 + $0x288] sm:$0xff] }
 0x122   :  { %v4158_v14 = vsel %vm4157_vm10, %v4134_v13, %v4136_v59  ;;  %v4138_v15 = vpop.permute.xlu0 %4137  ;;  %5817 = vmatmul.mubr.msk.f32.vlgmr.msra.gmra.mrb[2].mxu1 %vm98_vm2, %v5805_v44  ;;  %4258 = vmatprep.mubr.f32.mxu0 %v6528_v5  ;;  %v6257_v62 = vpack.c.bf16 %v4693_v61, %v4692_v60  ;;  %v4683_v13 = vld [vmem:[%s7865_s3 + $0xc8] sm:$0xff]  ;;  %v4701_v50 = vld [vmem:[%s7865_s3 + $0x158] sm:$0xff]  ;;  %v4720_v61 = vld [vmem:[%s7865_s3 + $0x1f0] sm:$0xff] }
 0x123   :  { %v4159_v16 = vsel %vm4157_vm10, %v4136_v59, %v4138_v15  ;;  %6127 = vmatprep.subr.mxu1 %v6528_v5  ;;  %6129 = vmatprep.mubr.msk.f32.mxu1 %vm6535_vm3, %v6528_v5  ;;  %v4665_v59 = vld [vmem:[%s7865_s3 + $0x38] sm:$0xff]  ;;  %v6273_v51 = vpack.c.bf16 %v4701_v50, %v4700_v49  ;;  %v4754_v49 = vld [vmem:[%s7865_s3 + $0x300] sm:$0xff]  ;;  %v4755_v50 = vld [vmem:[%s7865_s3 + $0x308] sm:$0xff] }
 0x124   :  { %5824 = vmatprep.subr.msk.mxu0 %vm102_vm1, %v4159_v16  ;;  %v4711_v16 = vld [vmem:[%s7865_s3 + $0x1a8] sm:$0xff] }
 0x125   :  { %5825 = vmatpush1.msk.msra.mxu0 %vm102_vm1, %v4158_v14  ;;  %v4140_v18 = vpop.permute.xlu1 %4139  ;;  %v4710_v14 = vld [vmem:[%s7865_s3 + $0x1a0] sm:$0xff] }
 0x126   :  { %v3639_v19 = vpop.permute.xlu0 %3638  ;;  %5826 = vmatmul.mubr.msk.f32.vlgmr.msra.gmra.mrb[0].mxu0 %vm98_vm2, %v5823_v17  ;;  %v4160_v23 = vsel %vm4157_vm10, %v4138_v15, %v4140_v18 }
 0x127   :  { %v3651_v20 = vsel %vm3640_vm9, %v3637_v57, %v3639_v19  ;;  %4400 = vmatprep.mubr.f32.mxu0 %v6528_v5  ;;  %v4664_v57 = vld [vmem:[%s7865_s3 + $0x30] sm:$0xff]  ;;  %v6235_v19 = vpack.c.bf16 %v4683_v13, %v4682_v63 }
 0x128   :  { %6128 = vmatpush3.msk.msra.mxu1 %vm102_vm1, %v3651_v20  ;;  %v6233_v15 = vpack.c.bf16 %v4665_v59, %v4664_v57  ;;  %v6259_v20 = vpack.c.bf16 %v4711_v16, %v4710_v14  ;;  %v4702_v57 = vld [vmem:[%s7865_s3 + $0x160] sm:$0xff]  ;;  %v4704_v13 = vld [vmem:[%s7865_s3 + $0x170] sm:$0xff]  ;;  %v4705_v14 = vld [vmem:[%s7865_s3 + $0x178] sm:$0xff] }
 0x129   :  { %6130 = vmatmul.mubr.msk.f32.vlgmr.msra.gmra.mrb[18].mxu1 %vm98_vm2, %v5805_v44  ;;  %v4144_v3 = vpop.permute.xlu1 %4143  ;;  %v4662_v44 = vld [vmem:[%s7865_s3 + $0x20] sm:$0xff] }
 0x12a   :  { %v4142_v21 = vpop.permute.xlu0 %4141  ;;  %4329 = vmatprep.mubr.f32.mxu1 %v6528_v5  ;;  %v6229_v48 = vpack.c.bf16 %v4663_v45, %v4662_v44  ;;  %v4717_v44 = vld [vmem:[%s7865_s3 + $0x1d8] sm:$0xff]  ;;  %v4672_v45 = vld [vmem:[%s7865_s3 + $0x70] sm:$0xff] }
 0x12b   :  { %v4161_v22 = vsel %vm4157_vm10, %v4140_v18, %v4142_v21  ;;  %v4162_v25 = vsel %vm4157_vm10, %v4142_v21, %v4144_v3  ;;  %v4667_v18 = vld [vmem:[%s7865_s3 + $0x48] sm:$0xff] }
 0x12c   :  { %5827 = vmatprep.subr.msk.mxu1 %vm102_vm1, %v4161_v22  ;;  %v4695_v21 = vld [vmem:[%s7865_s3 + $0x128] sm:$0xff]  ;;  %v4684_v22 = vld [vmem:[%s7865_s3 + $0xd0] sm:$0xff] }
 0x12d   :  { %5828 = vmatpush1.msk.msra.mxu1 %vm102_vm1, %v4160_v23  ;;  %v4148_v24 = vpop.permute.xlu1 %4147  ;;  %v4685_v23 = vld [vmem:[%s7865_s3 + $0xd8] sm:$0xff] }
 0x12e   :  { %v4146_v1 = vpop.permute.xlu0 %4145  ;;  %5829 = vmatmul.mubr.msk.f32.vlgmr.msra.gmra.mrb[0].mxu1 %vm98_vm2, %v5823_v17 }
 0x12f   :  { %v4163_v0 = vsel %vm4157_vm10, %v4144_v3, %v4146_v1  ;;  %4471 = vmatprep.mubr.f32.mxu1 %v6528_v5  ;;  %v4164_v6 = vsel %vm4157_vm10, %v4146_v1, %v4148_v24  ;;  %v4694_v3 = vld [vmem:[%s7865_s3 + $0x120] sm:$0xff]  ;;  %v4713_v1 = vld [vmem:[%s7865_s3 + $0x1b8] sm:$0xff] }
 0x130   :  { %5830 = vmatprep.subr.msk.mxu0 %vm102_vm1, %v4163_v0  ;;  %v6261_v0 = vpack.c.bf16 %v4695_v21, %v4694_v3 }
 0x131   :  { %5831 = vmatpush1.msk.msra.mxu0 %vm102_vm1, %v4162_v25  ;;  %v4152_v26 = vpop.permute.xlu1 %4151 }
 0x132   :  { %v4150_v27 = vpop.permute.xlu0 %4149  ;;  %5832 = vmatmul.mubr.msk.f32.vlgmr.msra.gmra.mrb[2].mxu0 %vm98_vm2, %v5823_v17 }
 0x133   :  { %v4165_v28 = vsel %vm4157_vm10, %v4148_v24, %v4150_v27  ;;  %4542 = vmatprep.mubr.f32.mxu0 %v6528_v5  ;;  %v4166_v30 = vsel %vm4157_vm10, %v4150_v27, %v4152_v26  ;;  %v4712_v24 = vld [vmem:[%s7865_s3 + $0x1b0] sm:$0xff] }
 0x134   :  { %5833 = vmatprep.subr.msk.mxu1 %vm102_vm1, %v4165_v28  ;;  %v4696_v27 = vld [vmem:[%s7865_s3 + $0x130] sm:$0xff]  ;;  %v4697_v28 = vld [vmem:[%s7865_s3 + $0x138] sm:$0xff] }
 0x135   :  { %5834 = vmatpush1.msk.msra.mxu1 %vm102_vm1, %v4164_v6  ;;  %v4156_v29 = vpop.permute.xlu1 %4155  ;;  %v4668_v6 = vld [vmem:[%s7865_s3 + $0x50] sm:$0xff]  ;;  %v6265_v7 = vpack.c.bf16 %v4697_v28, %v4696_v27 }
 0x136   :  { %v4154_v2 = vpop.permute.xlu0 %4153  ;;  %5835 = vmatmul.mubr.msk.f32.vlgmr.msra.gmra.mrb[2].mxu1 %vm98_vm2, %v5823_v17  ;;  %6132 = vmatprep.subr.mxu1 %v6528_v5 }
 0x137   :  { %v4167_v4 = vsel %vm4157_vm10, %v4152_v26, %v4154_v2  ;;  %v4168_v31 = vsel %vm4157_vm10, %v4154_v2, %v4156_v29  ;;  %6134 = vmatprep.mubr.msk.f32.mxu1 %vm6535_vm3, %v6528_v5  ;;  %v6263_v26 = vpack.c.bf16 %v4713_v1, %v4712_v24  ;;  %v6239_v29 = vpack.c.bf16 %v4685_v23, %v4684_v22  ;;  %v4714_v2 = vld [vmem:[%s7865_s3 + $0x1c0] sm:$0xff] }
 0x138   :  { %5836 = vmatprep.subr.msk.mxu0 %vm102_vm1, %v4167_v4  ;;  %6133 = vmatpush3.msk.msra.mxu1 %vm102_vm1, %v4168_v31  ;;  %v4715_v4 = vld [vmem:[%s7865_s3 + $0x1c8] sm:$0xff]  ;;  %v4686_v31 = vld [vmem:[%s7865_s3 + $0xe0] sm:$0xff] }
 0x139   :  { %5837 = vmatpush1.msk.msra.mxu0 %vm102_vm1, %v4166_v30  ;;  %6252 = vmatprep.subr.bf16.mxu1 %v6251_v43  ;;  %v4669_v30 = vld [vmem:[%s7865_s3 + $0x58] sm:$0xff]  ;;  %v6243_v8 = vpack.c.bf16 %v4687_v32, %v4686_v31  ;;  %v6247_v43 = vpack.c.bf16 %v4689_v41, %v4688_v40  ;;  %v4722_v32 = vld [vmem:[%s7865_s3 + $0x200] sm:$0xff]  ;;  %v4743_v41 = vld [vmem:[%s7865_s3 + $0x2a8] sm:$0xff] }
 0x13a   :  { %5838 = vmatmul.mubr.msk.f32.vlgmr.msra.gmra.mrb[4].mxu0 %vm98_vm2, %v5823_v17  ;;  %6135 = vmatmul.mubr.msk.f32.vlgmr.msra.gmra.mrb[20].mxu1 %vm98_vm2, %v5823_v17  ;;  %v4666_v17 = vld [vmem:[%s7865_s3 + $0x40] sm:$0xff]  ;;  %v6241_v10 = vpack.c.bf16 %v4669_v30, %v4668_v6 }
 0x13b   :  { %6220 = vmatprep.subr.bf16.mxu0 %v6219_v33  ;;  %6254 = vmatpush3.bf16.msra.mxu1 %v6253_v53  ;;  %v6237_v25 = vpack.c.bf16 %v4667_v18, %v4666_v17  ;;  %v6267_v33 = vpack.c.bf16 %v4715_v4, %v4714_v2  ;;  %v4719_v53 = vld [vmem:[%s7865_s3 + $0x1e8] sm:$0xff]  ;;  %v4742_v40 = vld [vmem:[%s7865_s3 + $0x2a0] sm:$0xff] }
 0x13c   :  { %6222 = vmatpush3.bf16.msra.mxu0 %v6221_v9  ;;  %6256 = vmatprep.subr.bf16.mxu1 %v6255_v58  ;;  %v4670_v9 = vld [vmem:[%s7865_s3 + $0x60] sm:$0xff]  ;;  %v4703_v58 = vld [vmem:[%s7865_s3 + $0x168] sm:$0xff] }
 0x13d   :  { %6224 = vmatprep.subr.bf16.mxu0 %v6223_v36  ;;  %v4671_v36 = vld [vmem:[%s7865_s3 + $0x68] sm:$0xff]  ;;  %v6277_v60 = vpack.c.bf16 %v4703_v58, %v4702_v57 }
 0x13e   :  { %v6245_v38 = vpack.c.bf16 %v4671_v36, %v4670_v9 }
 0x13f   :  { %6258 = vmatpush3.bf16.msra.mxu1 %v6257_v62  ;;  %v4721_v62 = vld [vmem:[%s7865_s3 + $0x1f8] sm:$0xff] }
 0x140   :  { %6226 = vmatpush3.bf16.msra.mxu0 %v6225_v39  ;;  %6260 = vmatprep.subr.bf16.mxu1 %v6259_v20  ;;  %v6279_v63 = vpack.c.bf16 %v4721_v62, %v4720_v61  ;;  %v4771_v20 = vld [vmem:[%s7865_s3 + $0x388] sm:$0xff]  ;;  %v4729_v61 = vld [vmem:[%s7865_s3 + $0x238] sm:$0xff] }
 0x141   :  { %6228 = vmatprep.subr.bf16.mxu0 %v6227_v42  ;;  %v4716_v42 = vld [vmem:[%s7865_s3 + $0x1d0] sm:$0xff] }
 0x143   :  { %6262 = vmatpush3.bf16.msra.mxu1 %v6261_v0 }
 0x144   :  { %6230 = vmatpush3.bf16.msra.mxu0 %v6229_v48  ;;  %6264 = vmatprep.subr.bf16.mxu1 %v6263_v26  ;;  %v6249_v48 = vpack.c.bf16 %v4673_v46, %v4672_v45  ;;  %v4727_v45 = vld [vmem:[%s7865_s3 + $0x228] sm:$0xff] }
 0x145   :  { %6232 = vmatprep.subr.bf16.mxu0 %v6231_v54  ;;  %v4738_v54 = vld [vmem:[%s7865_s3 + $0x280] sm:$0xff] }
 0x146   :  { %v6283_v59 = vpack.c.bf16 %v4739_v56, %v4738_v54  ;;  %v4772_v54 = vld [vmem:[%s7865_s3 + $0x390] sm:$0xff] }
 0x147   :  { %6266 = vmatpush3.bf16.msra.mxu1 %v6265_v7  ;;  %v7409_v30 = vpop.permute.xlu0 %4633  ;;  %v4723_v7 = vld [vmem:[%s7865_s3 + $0x208] sm:$0xff] }
 0x148   :  { %6234 = vmatpush3.bf16.msra.mxu0 %v6233_v15  ;;  %6268 = vmatprep.subr.bf16.mxu1 %v6267_v33  ;;  %v6281_v15 = vpack.c.bf16 %v4705_v14, %v4704_v13  ;;  %v4740_v33 = vld [vmem:[%s7865_s3 + $0x290] sm:$0xff] }
 0x149   :  { %6236 = vmatprep.subr.bf16.mxu0 %v6235_v19  ;;  %v4770_v19 = vld [vmem:[%s7865_s3 + $0x380] sm:$0xff] }
 0x14a   :  { %v6315_v3 = vpack.c.bf16 %v4771_v20, %v4770_v19  ;;  %v4747_v19 = vld [vmem:[%s7865_s3 + $0x2c8] sm:$0xff]  ;;  %v4774_v20 = vld [vmem:[%s7865_s3 + $0x3a0] sm:$0xff] }
 0x14b   :  { %6270 = vmatpush3.bf16.msra.mxu1 %v6269_v37  ;;  %v6285_v37 = vpack.c.bf16 %v4723_v7, %v4722_v32  ;;  %v4777_v32 = vld [vmem:[%s7865_s3 + $0x3b8] sm:$0xff] }
 0x14c   :  { %6238 = vmatpush3.bf16.msra.mxu0 %v6237_v25 }
 0x14d   :  { %6240 = vmatprep.subr.bf16.mxu0 %v6239_v29 }
 0x150   :  { %6242 = vmatpush3.bf16.msra.mxu0 %v6241_v10 }
 0x151   :  { %6244 = vmatprep.subr.bf16.mxu0 %v6243_v8 }
 0x154   :  { %6246 = vmatpush3.bf16.msra.mxu0 %v6245_v38  ;;  %v6287_v38 = vpack.c.bf16 %v4741_v34, %v4740_v33 }
 0x155   :  { %6248 = vmatprep.subr.bf16.mxu0 %v6247_v43 }
 0x158   :  { %6250 = vmatpush3.bf16.msra.mxu0 %v6249_v48  ;;  %v6291_v48 = vpack.c.bf16 %v4743_v41, %v4742_v40  ;;  %v4761_v40 = vld [vmem:[%s7865_s3 + $0x338] sm:$0xff]  ;;  %v4750_v41 = vld [vmem:[%s7865_s3 + $0x2e0] sm:$0xff] }
 0x159   :  { %6284 = vmatprep.subr.bf16.mxu0 %v6283_v59  ;;  %v6317_v59 = vpack.c.bf16 %v4755_v50, %v4754_v49 }
 0x165   :  { %v7247_v47 = vpop.f32.mrb[4].mxu1 }
 0x166   :  { %v6096_v52 = vpop.f32.mrb[5].mxu1 }
 0x167   :  { %v4718_v52 = vld [vmem:[%s7865_s3 + $0x1e0] sm:$0xff] }
 0x168   :  { %v6275_v55 = vpack.c.bf16 %v4719_v53, %v4718_v52  ;;  %v4745_v53 = vld [vmem:[%s7865_s3 + $0x2b8] sm:$0xff] }
 0x175   :  { %v1007_v12 = vpop.f32.mrb[6].mxu1 }
 0x176   :  { %v1008_v39 = vadd.f32 %v1007_v12, %v7247_v47  ;;  %v6101_v11 = vpop.f32.mrb[7].mxu1  ;;  %v6271_v47 = vpack.c.bf16 %v4717_v44, %v4716_v42  ;;  %v4726_v44 = vld [vmem:[%s7865_s3 + $0x220] sm:$0xff] }
 0x177   :  { %v4725_v11 = vld [vmem:[%s7865_s3 + $0x218] sm:$0xff]  ;;  %v6293_v58 = vpack.c.bf16 %v4727_v45, %v4726_v44  ;;  %v4779_v44 = vld [vmem:[%s7865_s3 + $0x3c8] sm:$0xff] }
 0x178   :  { %6272 = vmatprep.subr.bf16.mxu1 %v6271_v47 }
 0x179   :  { %6274 = vmatpush3.bf16.msra.mxu1 %v6273_v51  ;;  %v4744_v51 = vld [vmem:[%s7865_s3 + $0x2b0] sm:$0xff] }
 0x17a   :  { %6276 = vmatprep.subr.bf16.mxu1 %v6275_v55  ;;  %v4773_v55 = vld [vmem:[%s7865_s3 + $0x398] sm:$0xff]  ;;  %v6295_v13 = vpack.c.bf16 %v4745_v53, %v4744_v51  ;;  %v4762_v51 = vld [vmem:[%s7865_s3 + $0x340] sm:$0xff]  ;;  %v4752_v53 = vld [vmem:[%s7865_s3 + $0x2f0] sm:$0xff] }
 0x17b   :  { %v6319_v14 = vpack.c.bf16 %v4773_v55, %v4772_v54  ;;  %v4753_v54 = vld [vmem:[%s7865_s3 + $0x2f8] sm:$0xff]  ;;  %v4780_v55 = vld [vmem:[%s7865_s3 + $0x3d0] sm:$0xff] }
 0x17d   :  { %6278 = vmatpush3.bf16.msra.mxu1 %v6277_v60  ;;  %v4728_v60 = vld [vmem:[%s7865_s3 + $0x230] sm:$0xff] }
 0x17e   :  { %6280 = vmatprep.subr.bf16.mxu1 %v6279_v63 }
 0x181   :  { %6282 = vmatpush3.bf16.msra.mxu1 %v6281_v15  ;;  %v4756_v15 = vld [vmem:[%s7865_s3 + $0x310] sm:$0xff] }
 0x182   :  { %6316 = vmatprep.subr.bf16.mxu1 %v6315_v3  ;;  %v4775_v3 = vld [vmem:[%s7865_s3 + $0x3a8] sm:$0xff] }
 0x184   :  { %v1513_v16 = vpop.f32.mrb[8].mxu1 }
 0x185   :  { %v1527_v17 = vadd.f32 %v1513_v16, %v1008_v39  ;;  %v6106_v18 = vpop.f32.mrb[9].mxu1  ;;  %v4724_v39 = vld [vmem:[%s7865_s3 + $0x210] sm:$0xff]  ;;  %v4757_v16 = vld [vmem:[%s7865_s3 + $0x318] sm:$0xff] }
 0x186   :  { %v6289_v43 = vpack.c.bf16 %v4725_v11, %v4724_v39  ;;  %v4760_v11 = vld [vmem:[%s7865_s3 + $0x330] sm:$0xff] }
 0x196   :  { %v2030_v21 = vpop.f32.mrb[10].mxu1 }
 0x197   :  { %v2044_v22 = vadd.f32 %v2030_v21, %v1527_v17  ;;  %v6111_v23 = vpop.f32.mrb[11].mxu1  ;;  %v4746_v17 = vld [vmem:[%s7865_s3 + $0x2c0] sm:$0xff] }
 0x198   :  { %v6297_v23 = vpack.c.bf16 %v4729_v61, %v4728_v60  ;;  %v4736_v60 = vld [vmem:[%s7865_s3 + $0x270] sm:$0xff]  ;;  %v4737_v61 = vld [vmem:[%s7865_s3 + $0x278] sm:$0xff] }
 0x1ae   :  { %v2547_v24 = vpop.f32.mrb[12].mxu1 }
 0x1af   :  { %v2561_v1 = vadd.f32 %v2547_v24, %v2044_v22  ;;  %v6116_v0 = vpop.f32.mrb[13].mxu1  ;;  %v6321_v24 = vpack.c.bf16 %v4757_v16, %v4756_v15  ;;  %v4782_v15 = vld [vmem:[%s7865_s3 + $0x3e0] sm:$0xff]  ;;  %v4783_v16 = vld [vmem:[%s7865_s3 + $0x3e8] sm:$0xff] }
 0x1b0   :  { %v4731_v0 = vld [vmem:[%s7865_s3 + $0x248] sm:$0xff] }
 0x1c6   :  { %v3064_v25 = vpop.f32.mrb[14].mxu1 }
 0x1c7   :  { %v3078_v26 = vadd.f32 %v3064_v25, %v2561_v1  ;;  %v6121_v6 = vpop.f32.mrb[15].mxu1  ;;  %v4730_v1 = vld [vmem:[%s7865_s3 + $0x240] sm:$0xff] }
 0x1c8   :  { %v6323_v6 = vpack.c.bf16 %v4775_v3, %v4774_v20  ;;  %v6301_v34 = vpack.c.bf16 %v4731_v0, %v4730_v1  ;;  %v4766_v3 = vld [vmem:[%s7865_s3 + $0x360] sm:$0xff]  ;;  %v4767_v1 = vld [vmem:[%s7865_s3 + $0x368] sm:$0xff] }
 0x1c9   :  { %v4786_v0 = vld [vmem:[%s7865_s3 + $0x400] sm:$0xff] }
 0x1e1   :  { %v3581_v27 = vpop.f32.mrb[16].mxu1 }
 0x1e2   :  { %v3595_v28 = vadd.f32 %v3581_v27, %v3078_v26  ;;  %v6126_v29 = vpop.f32.mrb[17].mxu1  ;;  %v6299_v26 = vpack.c.bf16 %v4747_v19, %v4746_v17  ;;  %v4758_v27 = vld [vmem:[%s7865_s3 + $0x320] sm:$0xff]  ;;  %v6313_v19 = vpack.c.bf16 %v4737_v61, %v4736_v60  ;;  %v4795_v61 = vld [vmem:[%s7865_s3 + $0x448] sm:$0xff] }
 0x1e3   :  { %v4748_v29 = vld [vmem:[%s7865_s3 + $0x2d0] sm:$0xff]  ;;  %v4802_v17 = vld [vmem:[%s7865_s3 + $0x480] sm:$0xff] }
 0x1f9   :  { %v4260_v2 = vpop.f32.mrb[0].mxu0 }
 0x1fa   :  { %v4636_v4 = vadd.f32 %v7409_v30, %v4260_v2  ;;  %v4262_v31 = vpop.f32.mrb[1].mxu0 }
 0x1fb   :  { %v4637_v10 = vadd.f32 %v7409_v30, %v4262_v31  ;;  %v4776_v31 = vld [vmem:[%s7865_s3 + $0x3b0] sm:$0xff] }
 0x1fc   :  { %v4098_v35 = vpop.f32.mrb[18].mxu1  ;;  %v4647_v12 = vmax.f32 %v4636_v4, 0.0  ;;  %v4749_v4 = vld [vmem:[%s7865_s3 + $0x2d8] sm:$0xff]  ;;  %v6327_v39 = vpack.c.bf16 %v4777_v32, %v4776_v31 }
 0x1fd   :  { %v4648_v8 = vmax.f32 %v4637_v10, 0.0  ;;  %v7425_v9 = vadd.f32 %v4098_v35, %v3595_v28  ;;  %v6131_v36 = vpop.f32.mrb[19].mxu1  ;;  %v4759_v28 = vld [vmem:[%s7865_s3 + $0x328] sm:$0xff] }
 0x1fe   :  { %v6325_v35 = vpack.c.bf16 %v4759_v28, %v4758_v27  ;;  %v4733_v36 = vld [vmem:[%s7865_s3 + $0x258] sm:$0xff]  ;;  %v4804_v27 = vld [vmem:[%s7865_s3 + $0x490] sm:$0xff] }
 0x1ff   :  { %4898 = vmatprep.mubr.f32.mxu0 %v4648_v8  ;;  %v4732_v8 = vld [vmem:[%s7865_s3 + $0x250] sm:$0xff]  ;;  %v4805_v28 = vld [vmem:[%s7865_s3 + $0x498] sm:$0xff] }
 0x200   :  { %4899 = vmatmul.mubr.f32.vlgmr.msra.gmra.mrb[6].mxu0 %v4647_v12  ;;  %v6305_v45 = vpack.c.bf16 %v4733_v36, %v4732_v8  ;;  %v4806_v8 = vld [vmem:[%s7865_s3 + $0x4a0] sm:$0xff]  ;;  %v4807_v36 = vld [vmem:[%s7865_s3 + $0x4a8] sm:$0xff] }
 0x201   :  { %6286 = vmatpush3.bf16.msra.mxu0 %v6285_v37  ;;  %v4331_v42 = vpop.f32.mrb[0].mxu1 }
 0x202   :  { %v4638_v46 = vadd.f32 %v7409_v30, %v4331_v42  ;;  %v4333_v47 = vpop.f32.mrb[1].mxu1  ;;  %6288 = vmatprep.subr.bf16.mxu0 %v6287_v38  ;;  %v6303_v38 = vpack.c.bf16 %v4749_v4, %v4748_v29  ;;  %v6341_v29 = vpack.c.bf16 %v4767_v1, %v4766_v3  ;;  %v4768_v4 = vld [vmem:[%s7865_s3 + $0x370] sm:$0xff]  ;;  %v4814_v3 = vld [vmem:[%s7865_s3 + $0x4e0] sm:$0xff] }
 0x203   :  { %v4639_v52 = vadd.f32 %v7409_v30, %v4333_v47  ;;  %v4734_v47 = vld [vmem:[%s7865_s3 + $0x260] sm:$0xff] }
 0x204   :  { %v4649_v62 = vmax.f32 %v4638_v46, 0.0  ;;  %v6329_v46 = vpack.c.bf16 %v4761_v40, %v4760_v11  ;;  %v4790_v11 = vld [vmem:[%s7865_s3 + $0x420] sm:$0xff] }
 0x205   :  { %v4650_v56 = vmax.f32 %v4639_v52, 0.0  ;;  %6290 = vmatpush3.bf16.msra.mxu0 %v6289_v43  ;;  %v7465_v57 = vpop.f32.mrb[2].mxu0  ;;  %v4778_v43 = vld [vmem:[%s7865_s3 + $0x3c0] sm:$0xff]  ;;  %v4763_v52 = vld [vmem:[%s7865_s3 + $0x348] sm:$0xff] }
 0x206   :  { %v4404_v63 = vpop.f32.mrb[3].mxu0  ;;  %6292 = vmatprep.subr.bf16.mxu0 %v6291_v48  ;;  %v4735_v48 = vld [vmem:[%s7865_s3 + $0x268] sm:$0xff]  ;;  %v6331_v50 = vpack.c.bf16 %v4779_v44, %v4778_v43  ;;  %v4809_v44 = vld [vmem:[%s7865_s3 + $0x4b8] sm:$0xff]  ;;  %v4798_v1 = vld [vmem:[%s7865_s3 + $0x460] sm:$0xff] }
 0x207   :  { %v4641_v18 = vadd.f32 %v7409_v30, %v4404_v63  ;;  %4968 = vmatprep.mubr.f32.mxu1 %v4650_v56  ;;  %v4781_v56 = vld [vmem:[%s7865_s3 + $0x3d8] sm:$0xff]  ;;  %v4819_v43 = vld [vmem:[%s7865_s3 + $0x508] sm:$0xff] }
 0x208   :  { %4969 = vmatmul.mubr.f32.vlgmr.msra.gmra.mrb[22].mxu1 %v4649_v62  ;;  %v6311_v62 = vpack.c.bf16 %v4753_v54, %v4752_v53  ;;  %v6335_v63 = vpack.c.bf16 %v4781_v56, %v4780_v55  ;;  %v4821_v53 = vld [vmem:[%s7865_s3 + $0x518] sm:$0xff]  ;;  %v4810_v54 = vld [vmem:[%s7865_s3 + $0x4c0] sm:$0xff]  ;;  %v4811_v55 = vld [vmem:[%s7865_s3 + $0x4c8] sm:$0xff] }
 0x209   :  { %v4652_v21 = vmax.f32 %v4641_v18, 0.0  ;;  %6294 = vmatpush3.bf16.msra.mxu0 %v6293_v58  ;;  %6318 = vmatpush3.bf16.msra.mxu1 %v6317_v59  ;;  %v7492_v22 = vpop.f32.mrb[2].mxu1  ;;  %v6309_v58 = vpack.c.bf16 %v4735_v48, %v4734_v47  ;;  %v6333_v59 = vpack.c.bf16 %v4763_v52, %v4762_v51  ;;  %v4803_v18 = vld [vmem:[%s7865_s3 + $0x488] sm:$0xff]  ;;  %v4792_v47 = vld [vmem:[%s7865_s3 + $0x430] sm:$0xff]  ;;  %v4793_v51 = vld [vmem:[%s7865_s3 + $0x438] sm:$0xff]  ;;  %v6363_v60 = vpack.c.bf16 %v4811_v55, %v4810_v54 }
 0x20a   :  { %v4475_v25 = vpop.f32.mrb[3].mxu1  ;;  %6296 = vmatprep.subr.bf16.mxu0 %v6295_v13  ;;  %6320 = vmatprep.subr.bf16.mxu1 %v6319_v14  ;;  %v4764_v13 = vld [vmem:[%s7865_s3 + $0x350] sm:$0xff]  ;;  %v4765_v14 = vld [vmem:[%s7865_s3 + $0x358] sm:$0xff]  ;;  %v4642_v40 = vadd.f32 %v7409_v30, %v7492_v22  ;;  %v6361_v56 = vpack.c.bf16 %v4793_v51, %v4792_v47 }
 0x20b   :  { %v4643_v2 = vadd.f32 %v7409_v30, %v4475_v25  ;;  %5038 = vmatprep.mubr.f32.mxu0 %v4652_v21  ;;  %v6337_v20 = vpack.c.bf16 %v4765_v14, %v4764_v13  ;;  %v4640_v21 = vadd.f32 %v7409_v30, %v7465_v57  ;;  %v4787_v25 = vld [vmem:[%s7865_s3 + $0x408] sm:$0xff]  ;;  %v4784_v57 = vld [vmem:[%s7865_s3 + $0x3f0] sm:$0xff]  ;;  %v4813_v14 = vld [vmem:[%s7865_s3 + $0x4d8] sm:$0xff] }
 0x20c   :  { %v4808_v22 = vld [vmem:[%s7865_s3 + $0x4b0] sm:$0xff]  ;;  %v4653_v48 = vmax.f32 %v4642_v40, 0.0 }
 0x20d   :  { %v4654_v7 = vmax.f32 %v4643_v2, 0.0  ;;  %6298 = vmatpush3.bf16.msra.mxu0 %v6297_v23  ;;  %6322 = vmatpush3.bf16.msra.mxu1 %v6321_v24  ;;  %v7519_v10 = vpop.f32.mrb[4].mxu0  ;;  %v4615_v33 = vpop.f32.mrb[20].mxu1  ;;  %v6339_v23 = vpack.c.bf16 %v4783_v16, %v4782_v15  ;;  %v6347_v24 = vpack.c.bf16 %v4803_v18, %v4802_v17  ;;  %v6349_v2 = vpack.c.bf16 %v4787_v25, %v4786_v0  ;;  %v4820_v52 = vld [vmem:[%s7865_s3 + $0x510] sm:$0xff]  ;;  %v4799_v25 = vld [vmem:[%s7865_s3 + $0x468] sm:$0xff] }
 0x20e   :  { %v7528_v37 = vadd.f32 %v4615_v33, %v7425_v9  ;;  %v4546_v12 = vpop.f32.mrb[5].mxu0  ;;  %6300 = vmatprep.subr.bf16.mxu0 %v6299_v26  ;;  %6324 = vmatprep.subr.bf16.mxu1 %v6323_v6  ;;  %v6136_v42 = vpop.f32.mrb[21].mxu1  ;;  %v4751_v9 = vld [vmem:[%s7865_s3 + $0x2e8] sm:$0xff]  ;;  %v4785_v26 = vld [vmem:[%s7865_s3 + $0x3f8] sm:$0xff]  ;;  %v4651_v31 = vmax.f32 %v4640_v21, 0.0  ;;  %v4788_v33 = vld [vmem:[%s7865_s3 + $0x410] sm:$0xff] }
 0x20f   :  { %5108 = vmatprep.mubr.f32.mxu1 %v4654_v7  ;;  %v6307_v49 = vpack.c.bf16 %v4751_v9, %v4750_v41  ;;  %v4645_v6 = vadd.f32 %v7409_v30, %v4546_v12  ;;  %v6343_v32 = vpack.c.bf16 %v4785_v26, %v4784_v57  ;;  %v4769_v7 = vld [vmem:[%s7865_s3 + $0x378] sm:$0xff]  ;;  %v6355_v41 = vpack.c.bf16 %v4807_v36, %v4806_v8  ;;  %v4791_v42 = vld [vmem:[%s7865_s3 + $0x428] sm:$0xff]  ;;  %v4818_v9 = vld [vmem:[%s7865_s3 + $0x500] sm:$0xff] }
 0x210   :  { %v4812_v13 = vld [vmem:[%s7865_s3 + $0x4d0] sm:$0xff]  ;;  %v4815_v21 = vld [vmem:[%s7865_s3 + $0x4e8] sm:$0xff]  ;;  %v4826_v57 = vld [vmem:[%s7865_s3 + $0x540] sm:$0xff]  ;;  %v4646_v40 = vadd.f32 %v7409_v30, %v7528_v37 }
 0x211   :  { %6302 = vmatpush3.bf16.msra.mxu0 %v6301_v34  ;;  %6326 = vmatpush3.bf16.msra.mxu1 %v6325_v35  ;;  %v4789_v34 = vld [vmem:[%s7865_s3 + $0x418] sm:$0xff]  ;;  %v6351_v35 = vpack.c.bf16 %v4805_v28, %v4804_v27  ;;  %v4656_v12 = vmax.f32 %v4645_v6, 0.0  ;;  %v4796_v17 = vld [vmem:[%s7865_s3 + $0x450] sm:$0xff]  ;;  %v6367_v18 = vpack.c.bf16 %v4813_v14, %v4812_v13  ;;  %v6371_v0 = vpack.c.bf16 %v4815_v21, %v4814_v3  ;;  %v4827_v26 = vld [vmem:[%s7865_s3 + $0x548] sm:$0xff] }
 0x212   :  { %6304 = vmatprep.subr.bf16.mxu0 %v6303_v38  ;;  %6328 = vmatprep.subr.bf16.mxu1 %v6327_v39  ;;  %v6345_v38 = vpack.c.bf16 %v4769_v7, %v4768_v4  ;;  %v6353_v39 = vpack.c.bf16 %v4789_v34, %v4788_v33  ;;  %v4816_v6 = vld [vmem:[%s7865_s3 + $0x4f0] sm:$0xff]  ;;  %v4817_v27 = vld [vmem:[%s7865_s3 + $0x4f8] sm:$0xff]  ;;  %v6373_v28 = vpack.c.bf16 %v4799_v25, %v4798_v1  ;;  %v4830_v8 = vld [vmem:[%s7865_s3 + $0x560] sm:$0xff] }
 0x213   :  { %v6375_v4 = vpack.c.bf16 %v4817_v27, %v4816_v6  ;;  %v4829_v7 = vld [vmem:[%s7865_s3 + $0x558] sm:$0xff]  ;;  %v4831_v36 = vld [vmem:[%s7865_s3 + $0x568] sm:$0xff]  ;;  %v5384_v3 = vld [vmem:[%s7867_s6] sm:$0xff] }
 0x214   :  { %v5261_v37 = vld [vmem:[%s7862_s5 + $0x18] sm:$0xff] }
 0x215   :  { %6306 = vmatpush3.bf16.msra.mxu0 %v6305_v45  ;;  %6330 = vmatpush3.bf16.msra.mxu1 %v6329_v46  ;;  %v6357_v45 = vpack.c.bf16 %v4791_v42, %v4790_v11  ;;  %v6380_v46 = vpack.c.bf16 %v4819_v43, %v4818_v9  ;;  %v5254_v42 = vld [vmem:[%s7866_s4] sm:$0xff]  ;;  %v5393_v43 = vld [vmem:[%s7863_s7 + $0x8] sm:$0xff] }
 0x216   :  { %6308 = vmatprep.subr.bf16.mxu0 %v6307_v49  ;;  %6332 = vmatprep.subr.bf16.mxu1 %v6331_v50  ;;  %v6538_v49 = vmov 0.0|0.0   ;;  %v6359_v50 = vpack.c.bf16 %v4809_v44, %v4808_v22  ;;  %v5258_v9 = vld [vmem:[%s7862_s5] sm:$0xff]  ;;  %v5395_v22 = vld [vmem:[%s7863_s7 + $0x18] sm:$0xff]  ;;  %v5397_v44 = vld [vmem:[%s7863_s7 + $0x28] sm:$0xff] }
 0x217   :  { %5264 = vperm.xlu1 %6520, %v5258_v9  }
 0x219   :  { %6310 = vmatpush3.bf16.msra.mxu0 %v6309_v58  ;;  %6334 = vmatpush3.bf16.msra.mxu1 %v6333_v59  ;;  %v6383_v58 = vpack.c.bf16 %v4821_v53, %v4820_v52  ;;  %v4794_v59 = vld [vmem:[%s7865_s3 + $0x440] sm:$0xff] }
 0x21a   :  { %6312 = vmatprep.subr.bf16.mxu0 %v6311_v62  ;;  %6336 = vmatprep.subr.bf16.mxu1 %v6335_v63  ;;  %v4822_v62 = vld [vmem:[%s7865_s3 + $0x520] sm:$0xff]  ;;  %v4823_v63 = vld [vmem:[%s7865_s3 + $0x528] sm:$0xff]  ;;  %v6365_v15 = vpack.c.bf16 %v4795_v61, %v4794_v59 }
 0x21b   :  { %v6386_v16 = vpack.c.bf16 %v4823_v63, %v4822_v62 }
 0x21d   :  { %6314 = vmatpush3.bf16.msra.mxu0 %v6313_v19  ;;  %6338 = vmatpush3.bf16.msra.mxu1 %v6337_v20  ;;  %v4797_v19 = vld [vmem:[%s7865_s3 + $0x458] sm:$0xff] }
 0x21e   :  { %6340 = vmatprep.subr.bf16.mxu1 %v6339_v23  ;;  %6348 = vmatprep.subr.bf16.mxu0 %v6347_v24  ;;  %v4825_v20 = vld [vmem:[%s7865_s3 + $0x538] sm:$0xff]  ;;  %v6369_v23 = vpack.c.bf16 %v4797_v19, %v4796_v17  ;;  %v5255_v19 = vld [vmem:[%s7866_s4 + $0x8] sm:$0xff] }
 0x220   :  { %5039 = vmatmul.mubr.f32.vlgmr.msra.gmra.mrb[8].mxu0 %v4651_v31  ;;  %v4801_v31 = vld [vmem:[%s7865_s3 + $0x478] sm:$0xff] }
 0x221   :  { %6342 = vmatpush3.bf16.msra.mxu1 %v6341_v29  ;;  %6350 = vmatpush3.bf16.msra.mxu0 %v6349_v2  ;;  %v6392_v29 = vpack.c.bf16 %v4827_v26, %v4826_v57  ;;  %v4800_v2 = vld [vmem:[%s7865_s3 + $0x470] sm:$0xff] }
 0x222   :  { %5178 = vmatprep.mubr.f32.mxu0 %v4656_v12  ;;  %6344 = vmatprep.subr.bf16.mxu1 %v6343_v32  ;;  %v4828_v32 = vld [vmem:[%s7865_s3 + $0x550] sm:$0xff]  ;;  %v6377_v33 = vpack.c.bf16 %v4801_v31, %v4800_v2  ;;  %v6398_v12 = vpack.c.bf16 %v4831_v36, %v4830_v8  ;;  %v5387_v8 = vld [vmem:[%s7867_s6 + $0x18] sm:$0xff]  ;;  %v5388_v36 = vld [vmem:[%s7867_s6 + $0x20] sm:$0xff] }
 0x223   :  { %6352 = vmatprep.subr.bf16.mxu0 %v6351_v35  ;;  %v6395_v34 = vpack.c.bf16 %v4829_v7, %v4828_v32  ;;  %v4644_v35 = vadd.f32 %v7409_v30, %v7519_v10  ;;  %v4832_v10 = vld [vmem:[%s7865_s3 + $0x570] sm:$0xff]  ;;  %v5259_v30 = vld [vmem:[%s7862_s5 + $0x8] sm:$0xff] }
 0x224   :  { %5269 = vperm.xlu1 %6520, %v5259_v30  }
 0x225   :  { %6346 = vmatpush3.bf16.msra.mxu1 %v6345_v38  ;;  %6354 = vmatpush3.bf16.msra.mxu0 %v6353_v39  ;;  %v4655_v38 = vmax.f32 %v4644_v35, 0.0  ;;  %v4833_v39 = vld [vmem:[%s7865_s3 + $0x578] sm:$0xff]  ;;  %v5386_v35 = vld [vmem:[%s7867_s6 + $0x10] sm:$0xff] }
 0x226   :  { %6356 = vmatprep.subr.bf16.mxu0 %v6355_v41  ;;  %6379 = vmatprep.subr.bf16.mxu1 %v6538_v49  ;;  %v6401_v11 = vpack.c.bf16 %v4833_v39, %v4832_v10  ;;  %v4657_v41 = vmax.f32 %v4646_v40, 0.0  ;;  %v5391_v10 = vld [vmem:[%s7867_s6 + $0x38] sm:$0xff]  ;;  %v5578_v39 = vld [vmem:[%s7868_s8] sm:$0xff] }
 0x228   :  { %5109 = vmatmul.mubr.f32.vlgmr.msra.gmra.mrb[24].mxu1 %v4653_v48  ;;  %5279 = vperm.xlu1 %6520, %v5261_v37  }
 0x229   :  { %6358 = vmatpush3.bf16.msra.mxu0 %v6357_v45  ;;  %6381 = vmatpush3.bf16.msra.mxu1 %v6380_v46  ;;  %v5399_v45 = vld [vmem:[%s7863_s7 + $0x38] sm:$0xff]  ;;  %v5581_v46 = vld [vmem:[%s7864_s9 + $0x8] sm:$0xff] }
 0x22a   :  { %6360 = vmatprep.subr.bf16.mxu0 %v6359_v50  ;;  %6382 = vmatprep.subr.bf16.mxu1 %v6538_v49 }
 0x22b   :  { %6169 = vmatprep.mubr.msk.f32.mxu1 %vm6535_vm3, %v6528_v5  ;;  %v4824_v5 = vld [vmem:[%s7865_s3 + $0x530] sm:$0xff] }
 0x22c   :  { %v6389_v24 = vpack.c.bf16 %v4825_v20, %v4824_v5  ;;  %5407 = vperm.xlu1 %6520, %v5393_v43   ;;  %v5256_v5 = vld [vmem:[%s7866_s4 + $0x10] sm:$0xff]  ;;  %v5257_v20 = vld [vmem:[%s7866_s4 + $0x18] sm:$0xff] }
 0x22d   :  { %6362 = vmatpush3.bf16.msra.mxu0 %v6361_v56  ;;  %6384 = vmatpush3.bf16.msra.mxu1 %v6383_v58 }
 0x22e   :  { %6364 = vmatprep.subr.bf16.mxu0 %v6363_v60  ;;  %6385 = vmatprep.subr.bf16.mxu1 %v6538_v49 }
 0x230   :  { %5417 = vperm.xlu1 %6520, %v5395_v22  }
 0x231   :  { %6366 = vmatpush3.bf16.msra.mxu0 %v6365_v15  ;;  %6387 = vmatpush3.bf16.msra.mxu1 %v6386_v16 }
 0x232   :  { %6368 = vmatprep.subr.bf16.mxu0 %v6367_v18  ;;  %6388 = vmatprep.subr.bf16.mxu1 %v6538_v49 }
 0x234   :  { %5427 = vperm.xlu1 %6520, %v5397_v44  }
 0x235   :  { %6370 = vmatpush3.bf16.msra.mxu0 %v6369_v23  ;;  %6390 = vmatpush3.bf16.msra.mxu1 %v6389_v24 }
 0x236   :  { %6372 = vmatprep.subr.bf16.mxu0 %v6371_v0  ;;  %6391 = vmatprep.subr.bf16.mxu1 %v6538_v49 }
 0x238   :  { %5437 = vperm.xlu1 %6520, %v5399_v45  }
 0x239   :  { %6374 = vmatpush3.bf16.msra.mxu0 %v6373_v28  ;;  %6393 = vmatpush3.bf16.msra.mxu1 %v6392_v29  ;;  %v5275_v28 = vpop.permute.xlu0 %5274 }
 0x23a   :  { %6376 = vmatprep.subr.bf16.mxu0 %v6375_v4  ;;  %6394 = vmatprep.subr.bf16.mxu1 %v6538_v49 }
 0x23c   :  { %5589 = vperm.xlu1 %6520, %v5581_v46  }
 0x23d   :  { %6378 = vmatpush3.bf16.msra.mxu0 %v6377_v33  ;;  %6396 = vmatpush3.bf16.msra.mxu1 %v6395_v34  ;;  %v5385_v34 = vld [vmem:[%s7867_s6 + $0x8] sm:$0xff]  ;;  %v5403_v40 = vpop.permute.xlu0 %5402 }
 0x23e   :  { %6397 = vmatprep.subr.bf16.mxu1 %v6538_v49 }
 0x240   :  { %5179 = vmatmul.mubr.f32.vlgmr.msra.gmra.mrb[10].mxu0 %v4655_v38  ;;  %v5390_v38 = vld [vmem:[%s7867_s6 + $0x30] sm:$0xff] }
 0x241   :  { %6399 = vmatpush3.bf16.msra.mxu1 %v6398_v12  ;;  %6174 = vmatprep.mubr.msk.f32.mxu0 %vm5282_vm11, %v5254_v42  ;;  %v5389_v12 = vld [vmem:[%s7867_s6 + $0x28] sm:$0xff]  ;;  %v5413_v9 = vpop.permute.xlu0 %5412 }
 0x242   :  { %6400 = vmatprep.subr.bf16.mxu1 %v6538_v49 }
 0x245   :  { %6402 = vmatpush3.bf16.msra.mxu1 %v6401_v11 }
 0x248   :  { %6170 = vmatmul.mubr.f32.vlgmr.msra.gmra.mrb[26].mxu1 %v4657_v41 }
 0x249   :  { %6188 = vmatprep.mubr.msk.f32.mxu1 %vm5440_vm12, %v5384_v3 }
 0x296   :  { %v5265_v21 = vpop.permute.xlu1 %5264 }
 0x2a3   :  { %v5270_v23 = vpop.permute.xlu1 %5269 }
 0x2a7   :  { %v5280_v26 = vpop.permute.xlu1 %5279 }
 0x2ab   :  { %v5408_v11 = vpop.permute.xlu1 %5407 }
 0x2af   :  { %v5418_v41 = vpop.permute.xlu1 %5417 }
 0x2d3   :  { %v5905_v47 = vpop.f32.mrb[6].mxu0 }
 0x2d4   :  { %v5906_v48 = vpop.f32.mrb[7].mxu0 }
 0x2d5   :  { %v5907_v49 = vadd.f32 %v5906_v48, %v5905_v47  ;;  %v5428_v48 = vpop.permute.xlu1 %5427 }
 0x2db   :  { %v5940_v50 = vpop.f32.mrb[22].mxu1 }
 0x2dc   :  { %v5941_v51 = vpop.f32.mrb[23].mxu1 }
 0x2dd   :  { %v5942_v52 = vadd.f32 %v5941_v51, %v5940_v50  ;;  %v5423_v51 = vpop.permute.xlu0 %5422 }
 0x2df   :  { %v4971_v53 = vadd.f32 %v5942_v52, %v5907_v49 }
 0x2f3   :  { %v5975_v54 = vpop.f32.mrb[8].mxu0 }
 0x2f4   :  { %v5976_v55 = vpop.f32.mrb[9].mxu0 }
 0x2f5   :  { %v5977_v56 = vadd.f32 %v5976_v55, %v5975_v54 }
 0x2f7   :  { %v5041_v58 = vadd.f32 %v5977_v56, %v4971_v53 }
 0x2fb   :  { %v6010_v59 = vpop.f32.mrb[24].mxu1 }
 0x2fc   :  { %v6011_v60 = vpop.f32.mrb[25].mxu1 }
 0x2fd   :  { %v6012_v61 = vadd.f32 %v6011_v60, %v6010_v59 }
 0x2ff   :  { %v5111_v62 = vadd.f32 %v6012_v61, %v5041_v58  ;;  %v5438_v61 = vpop.permute.xlu1 %5437 }
 0x303   :  { %v5590_v3 = vpop.permute.xlu1 %5589 }
 0x313   :  { %v6045_v63 = vpop.f32.mrb[10].mxu0 }
 0x314   :  { %v6046_v13 = vpop.f32.mrb[11].mxu0 }
 0x315   :  { %v6047_v14 = vadd.f32 %v6046_v13, %v6045_v63  ;;  %v5433_v13 = vpop.permute.xlu0 %5432 }
 0x317   :  { %v5181_v15 = vadd.f32 %v6047_v14, %v5111_v62 }
 0x31b   :  { %v5250_v16 = vpop.f32.mrb[26].mxu1 }
 0x31c   :  { %v5251_v17 = vadd.f32 %v5250_v16, %v5181_v15  ;;  %v6171_v18 = vpop.f32.mrb[27].mxu1 }
 0x31e   :  { %6172 = vmatprep.subr.mxu0 %v5251_v17 }
 0x31f   :  { %6173 = vmatpush3.msra.mxu0 %v5251_v17 }
 0x320   :  { %6175 = vmatmul.mubr.msk.f32.vlgmr.msra.gmra.mrb[12].mxu0 %vm5282_vm11, %v5255_v19 }
 0x321   :  { %6177 = vmatprep.mubr.msk.f32.mxu0 %vm5282_vm11, %v5256_v5 }
 0x324   :  { %6178 = vmatmul.mubr.msk.f32.gmra.mrb[14].mxu0 %vm5282_vm11, %v5257_v20  ;;  %v5579_v20 = vld [vmem:[%s7868_s8 + $0x8] sm:$0xff] }
 0x325   :  { %6216 = vmatprep.mubr.msk.f32.mxu0 %vm5592_vm13, %v5578_v39 }
 0x3f3   :  { %v6176_v24 = vpop.f32.mrb[12].mxu0 }
 0x3f4   :  { %v5367_v1 = vadd.f32 %v6176_v24, %v5270_v23  ;;  %v5361_v0 = vpop.f32.mrb[13].mxu0  ;;  %v5585_v23 = vpop.permute.xlu0 %5584 }
 0x3f5   :  { %v5362_v25 = vadd.f32 %v5361_v0, %v5265_v21 }
 0x3f6   :  { %v5381_v57 = vmax.f32 %v5367_v1, 0.0 }
 0x3f7   :  { %v5380_v6 = vmax.f32 %v5362_v25, 0.0  ;;  %v6179_v27 = vpop.f32.mrb[14].mxu0 }
 0x3f8   :  { %v5377_v29 = vadd.f32 %v6179_v27, %v5280_v26  ;;  %v5371_v2 = vpop.f32.mrb[15].mxu0 }
 0x3f9   :  { %v6403_v4 = vpack.c.bf16 %v5381_v57, %v5380_v6  ;;  %v5372_v31 = vadd.f32 %v5371_v2, %v5275_v28 }
 0x3fa   :  { %v5383_v32 = vmax.f32 %v5377_v29, 0.0 }
 0x3fb   :  { %v5382_v7 = vmax.f32 %v5372_v31, 0.0  ;;  %6404 = vmatprep.subr.bf16.mxu1 %v6403_v4 }
 0x3fc   :  { %6406 = vmatpush3.bf16.msra.mxu1 %v6403_v4 }
 0x3fd   :  { %v6407_v33 = vpack.c.bf16 %v5383_v32, %v5382_v7 }
 0x3ff   :  { %6408 = vmatprep.subr.bf16.mxu1 %v6407_v33 }
 0x400   :  { %6410 = vmatpush3.bf16.msra.mxu1 %v6407_v33 }
 0x403   :  { %6189 = vmatmul.mubr.msk.f32.vlgmr.msra.gmra.mrb[28].mxu1 %vm5440_vm12, %v5385_v34 }
 0x404   :  { %6191 = vmatprep.mubr.msk.f32.mxu1 %vm5440_vm12, %v5386_v35 }
 0x407   :  { %6192 = vmatmul.mubr.msk.f32.gmra.mrb[30].mxu1 %vm5440_vm12, %v5387_v8 }
 0x408   :  { %6194 = vmatprep.mubr.msk.f32.mxu1 %vm5440_vm12, %v5388_v36 }
 0x40b   :  { %6195 = vmatmul.mubr.msk.f32.gmra.mrb[32].mxu1 %vm5440_vm12, %v5389_v12 }
 0x40c   :  { %6197 = vmatprep.mubr.msk.f32.mxu1 %vm5440_vm12, %v5390_v38 }
 0x40f   :  { %6198 = vmatmul.mubr.msk.f32.gmra.mrb[34].mxu1 %vm5440_vm12, %v5391_v10 }
 0x4d6   :  { %v6190_v42 = vpop.f32.mrb[28].mxu1 }
 0x4d7   :  { %v5537_v30 = vadd.f32 %v6190_v42, %v5408_v11  ;;  %v5531_v37 = vpop.f32.mrb[29].mxu1 }
 0x4d8   :  { %v5532_v43 = vadd.f32 %v5531_v37, %v5403_v40 }
 0x4d9   :  { %v5571_v22 = vmax.f32 %v5537_v30, 0.0 }
 0x4da   :  { %v5570_v44 = vmax.f32 %v5532_v43, 0.0  ;;  %v6193_v45 = vpop.f32.mrb[30].mxu1 }
 0x4db   :  { %v5547_v46 = vadd.f32 %v6193_v45, %v5418_v41  ;;  %v5541_v47 = vpop.f32.mrb[31].mxu1 }
 0x4dc   :  { %v6411_v49 = vpack.c.bf16 %v5571_v22, %v5570_v44  ;;  %v5542_v50 = vadd.f32 %v5541_v47, %v5413_v9 }
 0x4dd   :  { %v5573_v52 = vmax.f32 %v5547_v46, 0.0 }
 0x4de   :  { %v5572_v53 = vmax.f32 %v5542_v50, 0.0  ;;  %v6196_v54 = vpop.f32.mrb[32].mxu1  ;;  %6412 = vmatprep.subr.bf16.mxu0 %v6411_v49 }
 0x4df   :  { %v5557_v55 = vadd.f32 %v6196_v54, %v5428_v48  ;;  %v5551_v56 = vpop.f32.mrb[33].mxu1  ;;  %6414 = vmatpush3.bf16.msra.mxu0 %v6411_v49 }
 0x4e0   :  { %v6415_v58 = vpack.c.bf16 %v5573_v52, %v5572_v53  ;;  %v5552_v59 = vadd.f32 %v5551_v56, %v5423_v51 }
 0x4e1   :  { %v5575_v60 = vmax.f32 %v5557_v55, 0.0 }
 0x4e2   :  { %v5574_v62 = vmax.f32 %v5552_v59, 0.0  ;;  %v6199_v63 = vpop.f32.mrb[34].mxu1  ;;  %6416 = vmatprep.subr.bf16.mxu0 %v6415_v58 }
 0x4e3   :  { %v5567_v14 = vadd.f32 %v6199_v63, %v5438_v61  ;;  %v5561_v15 = vpop.f32.mrb[35].mxu1  ;;  %6418 = vmatpush3.bf16.msra.mxu0 %v6415_v58 }
 0x4e4   :  { %v6419_v16 = vpack.c.bf16 %v5575_v60, %v5574_v62  ;;  %v5562_v17 = vadd.f32 %v5561_v15, %v5433_v13 }
 0x4e5   :  { %v5577_v18 = vmax.f32 %v5567_v14, 0.0 }
 0x4e6   :  { %v5576_v19 = vmax.f32 %v5562_v17, 0.0  ;;  %6420 = vmatprep.subr.bf16.mxu0 %v6419_v16 }
 0x4e7   :  { %6422 = vmatpush3.bf16.msra.mxu0 %v6419_v16 }
 0x4e8   :  { %v6423_v5 = vpack.c.bf16 %v5577_v18, %v5576_v19 }
 0x4ea   :  { %6424 = vmatprep.subr.bf16.mxu0 %v6423_v5 }
 0x4eb   :  { %6426 = vmatpush3.bf16.msra.mxu0 %v6423_v5 }
 0x4ee   :  { %6217 = vmatmul.mubr.msk.f32.vlgmr.msra.gmra.mrb[16].mxu0 %vm5592_vm13, %v5579_v20 }
 0x5c1   :  { %v6218_v21 = vpop.f32.mrb[16].mxu0 }
 0x5c2   :  { %v5671_v24 = vadd.f32 %v6218_v21, %v5590_v3  ;;  %v5665_v1 = vpop.f32.mrb[17].mxu0 }
 0x5c3   :  { %v5666_v0 = vadd.f32 %v5665_v1, %v5585_v23 }
 0x5c4   :  { %5675 = vst.msk [vmem:[%s7869_s10 + $0x8] sm:$0xff] %vm98_vm2, %v5671_v24 }
 0x5c5   :  { %5674 = vst.msk [vmem:[%s7869_s10] sm:$0xff] %vm98_vm2, %v5666_v0 }

</bundles_post_ra>
